<compile_context>
chip_gen: v7x
topology: tpu7x:2x2x1
jax: 0.10.0
libtpu: 0.0.40
codegen_flags: <defaults>
</compile_context>

<pallas_src>
import numpy as np
import jax
import jax.numpy as jnp
from jax.experimental import pallas as pl
from jax.experimental.pallas import tpu as pltpu

_BN_EPS = 1e-5
_LANE = 128


def _round_up(v, m):
    return (v + m - 1) // m * m


# ----------------------------------------------------------------------------
# Operator construction (host-side numpy, done ONCE per set of weights)
# ----------------------------------------------------------------------------
def _sel_mask(k, n_out, n_in, stride, padding, transposed):
    """0/1 selection masks, one per kernel tap, along one spatial axis."""
    d = np.arange(k)[:, None, None]
    o = np.arange(n_out)[None, :, None]
    i = np.arange(n_in)[None, None, :]
    if transposed:
        m = (o == i * stride + d - padding)      # transposed-conv scatter rule
    else:
        m = (i == o * stride + d - padding)      # conv gather rule (cross-corr)
    return m.astype(np.float32)                  # (k, n_out, n_in)


def _conv_operators(w, H, W, stride, padding, transposed, batch):
    """Fold a (transposed) conv into:
         rw : (rows_in, kw*lane_blk) bf16  -- ONE wide channel*row contraction
              operator (weights folded in, all kw taps concatenated on lanes)
         cs : (kw, batch*OW, batch*W) f32  -- tiny 0/1 block-diagonal width
              selection matrices (exact stride + padding handling)
    """
    w = np.asarray(w, np.float32)
    if transposed:                               # ConvTranspose2d: (Cin,Cout,kh,kw)
        cin, cout, kh, kw = w.shape
        OH = (H - 1) * stride - 2 * padding + kh
        OW = (W - 1) * stride - 2 * padding + kw
        hmask = _sel_mask(kh, OH, H, stride, padding, True)      # (kh, OH, H)
        rw = np.einsum('ioab,aqh->bihoq', w, hmask)
    else:                                        # Conv2d: (Cout,Cin,kh,kw)
        cout, cin, kh, kw = w.shape
        OH = (H + 2 * padding - kh) // stride + 1
        OW = (W + 2 * padding - kw) // stride + 1
        hmask = _sel_mask(kh, OH, H, stride, padding, False)
        rw = np.einsum('oiab,aqh->bihoq', w, hmask)
    rw = rw.reshape(kw, cin * H, cout * OH)

    lane_blk = _round_up(cout * OH, _LANE)       # per-tap lane block, 128 aligned
    rows_in = _round_up(cin * H, _LANE)          # lane-dense contraction rows
    rwcat = np.zeros((rows_in, kw * lane_blk), np.float32)
    for dw in range(kw):
        rwcat[:cin * H, dw * lane_blk:dw * lane_blk + cout * OH] = rw[dw]

    wmask = _sel_mask(kw, OW, W, stride, padding, transposed)    # (kw, OW, W)
    eye = np.eye(batch, dtype=np.float32)
    cs = np.stack([np.kron(eye, wmask[dw]) for dw in range(kw)])  # (kw,B*OW,B*W)

    ops = (jnp.asarray(rwcat, jnp.bfloat16), jnp.asarray(cs, jnp.float32))
    meta = dict(kw=kw, lane_blk=lane_blk, rows_in=rows_in,
                OH=OH, OW=OW, cout=cout)
    return ops, meta


def _bn_params(gamma, beta, OH):
    ga = np.repeat(np.asarray(gamma, np.float32), OH)[None, :]   # (1, C*OH)
    be = np.repeat(np.asarray(beta, np.float32), OH)[None, :]
    return jnp.asarray(ga), jnp.asarray(be)


# ----------------------------------------------------------------------------
# Kernel
# ----------------------------------------------------------------------------
def _group_matrix(lanes, oh):
    """0/1 matrix gm[i,j] = (i//oh == j//oh), generated in-kernel (no DMA)."""
    shift = int(np.log2(oh))                     # oh is a power of two here
    r = jax.lax.broadcasted_iota(jnp.int32, (lanes, lanes), 0)
    c = jax.lax.broadcasted_iota(jnp.int32, (lanes, lanes), 1)
    return ((r >> shift) == (c >> shift)).astype(jnp.float32)


def _make_kernel(metas, bn_meta):
    """metas: 5 per-layer dicts.  bn_meta: 4 tuples (OH, lanes, 1/count)."""

    def conv_op(x, rw_ref, cs_ref, meta):
        # x: (Rin, CinH) f32, rw: (CinH, kw*128) bf16, cs: (kw, Rout, Rin) f32
        t = jnp.dot(x.astype(jnp.bfloat16), rw_ref[...],
                    preferred_element_type=jnp.float32)   # one wide MXU issue
        kw, blk = meta['kw'], meta['lane_blk']
        y = None
        for dw in range(kw):                              # tiny exact selection dots
            contrib = jnp.dot(cs_ref[dw], t[:, dw * blk:(dw + 1) * blk],
                              preferred_element_type=jnp.float32)
            y = contrib if y is None else y + contrib
        return y

    def batchnorm(y, gm, ga_ref, be_ref, inv_count):
        # y: (N*OW, C*OH) f32; channel c owns lanes [c*OH, (c+1)*OH)
        zg = jnp.dot(y, gm, preferred_element_type=jnp.float32)
        mean = jnp.sum(zg, axis=0, keepdims=True) * inv_count
        d = y - mean
        vg = jnp.dot(d * d, gm, preferred_element_type=jnp.float32)
        var = jnp.sum(vg, axis=0, keepdims=True) * inv_count
        scale = ga_ref[...] * jax.lax.rsqrt(var + _BN_EPS)
        shift = be_ref[...] - mean * scale
        return y * scale + shift                          # single fused affine

    def kernel(x_ref,
               rw1, cs1, ga1, be1,
               rw2, cs2, ga2, be2,
               rw3, cs3, ga3, be3,
               rw4, cs4, ga4, be4,
               rw5, cs5,
               out_ref):
        gm_cache = {}

        def gm_for(i):
            oh, lanes, _ = bn_meta[i]
            if (lanes, oh) not in gm_cache:
                gm_cache[(lanes, oh)] = _group_matrix(lanes, oh)
            return gm_cache[(lanes, oh)]

        x = x_ref[...]                                     # (N*32, 128) f32
        # conv1 -> BN -> relu      (32x32 -> 16x16)
        a = conv_op(x, rw1, cs1, metas[0])
        a = jnp.maximum(batchnorm(a, gm_for(0), ga1, be1, bn_meta[0][2]), 0.0)
        # conv2 -> BN -> relu      (16x16 -> 8x8)
        a = conv_op(a, rw2, cs2, metas[1])
        a = jnp.maximum(batchnorm(a, gm_for(1), ga2, be2, bn_meta[1][2]), 0.0)
        # resnet block: relu(x + BN(conv3x3(x)))   (8x8)
        r = conv_op(a, rw3, cs3, metas[2])
        r = batchnorm(r, gm_for(2), ga3, be3, bn_meta[2][2])
        a = jnp.maximum(a + r, 0.0)
        # deconv1 -> BN -> relu    (8x8 -> 16x16)
        a = conv_op(a, rw4, cs4, metas[3])
        a = jnp.maximum(batchnorm(a, gm_for(3), ga4, be4, bn_meta[3][2]), 0.0)
        # deconv2 -> tanh          (16x16 -> 32x32, lanes padded 96 -> 128)
        out_ref[...] = jnp.tanh(conv_op(a, rw5, cs5, metas[4]))

    return kernel


# ----------------------------------------------------------------------------
# Parameters + forward builder (operator prep hoisted out of the hot path)
# ----------------------------------------------------------------------------
def init_cycle_generator_params(key, conv_dim=8):
    ks = jax.random.split(key, 5)

    def w(k_, shape, fan_in):
        return jax.random.normal(k_, shape, jnp.float32) / jnp.sqrt(float(fan_in))

    d, d2 = conv_dim, conv_dim * 2
    return {
        "conv1_w": w(ks[0], (d, 3, 4, 4), 3 * 16),
        "conv1_gamma": jnp.ones((d,), jnp.float32),
        "conv1_beta": jnp.zeros((d,), jnp.float32),
        "conv2_w": w(ks[1], (d2, d, 4, 4), d * 16),
        "conv2_gamma": jnp.ones((d2,), jnp.float32),
        "conv2_beta": jnp.zeros((d2,), jnp.float32),
        "res_w": w(ks[2], (d2, d2, 3, 3), d2 * 9),
        "res_gamma": jnp.ones((d2,), jnp.float32),
        "res_beta": jnp.zeros((d2,), jnp.float32),
        # ConvTranspose2d weights: (Cin, Cout, kH, kW)
        "deconv1_w": w(ks[3], (d2, d, 4, 4), d2 * 16),
        "deconv1_gamma": jnp.ones((d,), jnp.float32),
        "deconv1_beta": jnp.zeros((d,), jnp.float32),
        "deconv2_w": w(ks[4], (d, 3, 4, 4), d * 16),
    }


def make_cycle_generator_forward(params, batch, in_ch=3, in_hw=32):
    N, C0, H0, W0 = batch, in_ch, in_hw, in_hw

    (rw1, cs1), m1 = _conv_operators(params["conv1_w"], H0, W0, 2, 1, False, N)
    (rw2, cs2), m2 = _conv_operators(params["conv2_w"], m1['OH'], m1['OW'], 2, 1, False, N)
    (rw3, cs3), m3 = _conv_operators(params["res_w"], m2['OH'], m2['OW'], 1, 1, False, N)
    (rw4, cs4), m4 = _conv_operators(params["deconv1_w"], m3['OH'], m3['OW'], 2, 1, True, N)
    (rw5, cs5), m5 = _conv_operators(params["deconv2_w"], m4['OH'], m4['OW'], 2, 1, True, N)
    metas = [m1, m2, m3, m4, m5]

    # BatchNorm: training-mode batch statistics (nn.BatchNorm2d default forward).
    # TODO(synk): switch to running-stats affine if the reference runs in eval().
    bn_meta, bn_affine = [], []
    for m, gk, bk in [(m1, "conv1_gamma", "conv1_beta"),
                      (m2, "conv2_gamma", "conv2_beta"),
                      (m3, "res_gamma", "res_beta"),
                      (m4, "deconv1_gamma", "deconv1_beta")]:
        lanes = m['cout'] * m['OH']
        assert lanes == m['lane_blk'], "BN layers require 128-dense lanes"
        assert m['OH'] & (m['OH'] - 1) == 0, "in-kernel group matrix needs pow2 OH"
        bn_meta.append((m['OH'], lanes, 1.0 / float(N * m['OW'] * m['OH'])))
        bn_affine.append(_bn_params(params[gk], params[bk], m['OH']))
    (ga1, be1), (ga2, be2), (ga3, be3), (ga4, be4) = bn_affine

    kernel = _make_kernel(metas, bn_meta)

    cout5, oh5, ow5 = m5['cout'], m5['OH'], m5['OW']
    out_rows, out_lanes = N * ow5, m5['lane_blk']
    in_lane_pad = m1['rows_in'] - C0 * H0

    op_args = (rw1, cs1, ga1, be1,
               rw2, cs2, ga2, be2,
               rw3, cs3, ga3, be3,
               rw4, cs4, ga4, be4,
               rw5, cs5)

    vmem = pl.BlockSpec(memory_space=pltpu.MemorySpace.VMEM)
    call = pl.pallas_call(
        kernel,
        out_shape=jax.ShapeDtypeStruct((out_rows, out_lanes), jnp.float32),
        in_specs=[vmem] * (1 + len(op_args)),
        out_specs=vmem,
    )

    @jax.jit
    def forward(x_nchw):
        # NCHW -> lane-dense kernel layout x[n*W + w, c*H + h] (tiny boundary op)
        xl = jnp.transpose(x_nchw.astype(jnp.float32), (0, 3, 1, 2))
        xl = xl.reshape(N * W0, C0 * H0)
        if in_lane_pad:
            xl = jnp.pad(xl, ((0, 0), (0, in_lane_pad)))
        y = call(xl, *op_args)
        # kernel layout y[n*OW + ow, c*OH + oh] (lane padded) -> NCHW
        y = y[:, :cout5 * oh5].reshape(N, ow5, cout5, oh5)
        return jnp.transpose(y, (0, 2, 3, 1))

    return forward


if __name__ == "__main__":
    key = jax.random.PRNGKey(0)
    k_params, k_x = jax.random.split(key)

    conv_dim = 8                                   # small deterministic config
    params = init_cycle_generator_params(k_params, conv_dim=conv_dim)
    x = jax.random.normal(k_x, (2, 3, 32, 32), jnp.float32)   # BS x 3 x 32 x 32

    forward = make_cycle_generator_forward(params, batch=2, in_ch=3, in_hw=32)
    y = jax.block_until_ready(forward(x))

    assert y.shape == (2, 3, 32, 32), y.shape
    assert bool(jnp.all(jnp.isfinite(y)))
    assert bool(jnp.all(jnp.abs(y) <= 1.0 + 1e-6))   # tanh output range
    print("KERNEL_OK")
</pallas_src>

<mosaic_0001>
module attributes {stable_mosaic.version = 11 : i64} {
  func.func @kernel(%arg0: memref<64x128xf32, #tpu.memory_space<vmem>>, %arg1: memref<128x512xbf16, #tpu.memory_space<vmem>>, %arg2: memref<4x32x64xf32, #tpu.memory_space<vmem>>, %arg3: memref<1x128xf32, #tpu.memory_space<vmem>>, %arg4: memref<1x128xf32, #tpu.memory_space<vmem>>, %arg5: memref<128x512xbf16, #tpu.memory_space<vmem>>, %arg6: memref<4x16x32xf32, #tpu.memory_space<vmem>>, %arg7: memref<1x128xf32, #tpu.memory_space<vmem>>, %arg8: memref<1x128xf32, #tpu.memory_space<vmem>>, %arg9: memref<128x384xbf16, #tpu.memory_space<vmem>>, %arg10: memref<3x16x16xf32, #tpu.memory_space<vmem>>, %arg11: memref<1x128xf32, #tpu.memory_space<vmem>>, %arg12: memref<1x128xf32, #tpu.memory_space<vmem>>, %arg13: memref<128x512xbf16, #tpu.memory_space<vmem>>, %arg14: memref<4x32x16xf32, #tpu.memory_space<vmem>>, %arg15: memref<1x128xf32, #tpu.memory_space<vmem>>, %arg16: memref<1x128xf32, #tpu.memory_space<vmem>>, %arg17: memref<128x512xbf16, #tpu.memory_space<vmem>>, %arg18: memref<4x64x32xf32, #tpu.memory_space<vmem>>, %arg19: memref<64x128xf32, #tpu.memory_space<vmem>>) attributes {dimension_semantics = [], scalar_prefetch = 0 : i64, scratch_operands = 0 : i64, tpu.core_type = #tpu.core_type<tc>} {
    %c0 = arith.constant 0 : index
    %c0_0 = arith.constant 0 : index
    %0 = vector.load %arg0[%c0, %c0_0] : memref<64x128xf32, #tpu.memory_space<vmem>>, vector<64x128xf32>
    %1 = arith.truncf %0 : vector<64x128xf32> to vector<64x128xbf16>
    %c0_1 = arith.constant 0 : index
    %c0_2 = arith.constant 0 : index
    %2 = vector.load %arg1[%c0_1, %c0_2] : memref<128x512xbf16, #tpu.memory_space<vmem>>, vector<128x512xbf16>
    %cst = arith.constant dense<0.000000e+00> : vector<64x512xf32>
    %3 = tpu.matmul %1, %2, %cst {dimension_numbers = #tpu.dot_dimension_numbers<[1], [0], [0], [1], [0, 0, 1, 1], [], []>} : vector<64x128xbf16>, vector<128x512xbf16>, vector<64x512xf32> -> vector<64x512xf32>
    %c0_3 = arith.constant 0 : index
    %c0_4 = arith.constant 0 : index
    %c0_5 = arith.constant 0 : index
    %4 = vector.load %arg2[%c0_3, %c0_4, %c0_5] : memref<4x32x64xf32, #tpu.memory_space<vmem>>, vector<1x32x64xf32>
    %5 = vector.shape_cast %4 : vector<1x32x64xf32> to vector<32x64xf32>
    %6 = vector.extract_strided_slice %3 {offsets = [0, 0], sizes = [64, 128], strides = [1, 1]} : vector<64x512xf32> to vector<64x128xf32>
    %cst_6 = arith.constant dense<0.000000e+00> : vector<32x128xf32>
    %7 = tpu.matmul %5, %6, %cst_6 {dimension_numbers = #tpu.dot_dimension_numbers<[1], [0], [0], [1], [0, 0, 1, 1], [], []>} : vector<32x64xf32>, vector<64x128xf32>, vector<32x128xf32> -> vector<32x128xf32>
    %c1 = arith.constant 1 : index
    %c0_7 = arith.constant 0 : index
    %c0_8 = arith.constant 0 : index
    %8 = vector.load %arg2[%c1, %c0_7, %c0_8] : memref<4x32x64xf32, #tpu.memory_space<vmem>>, vector<1x32x64xf32>
    %9 = vector.shape_cast %8 : vector<1x32x64xf32> to vector<32x64xf32>
    %10 = vector.extract_strided_slice %3 {offsets = [0, 128], sizes = [64, 128], strides = [1, 1]} : vector<64x512xf32> to vector<64x128xf32>
    %cst_9 = arith.constant dense<0.000000e+00> : vector<32x128xf32>
    %11 = tpu.matmul %9, %10, %cst_9 {dimension_numbers = #tpu.dot_dimension_numbers<[1], [0], [0], [1], [0, 0, 1, 1], [], []>} : vector<32x64xf32>, vector<64x128xf32>, vector<32x128xf32> -> vector<32x128xf32>
    %12 = arith.addf %7, %11 : vector<32x128xf32>
    %c2 = arith.constant 2 : index
    %c0_10 = arith.constant 0 : index
    %c0_11 = arith.constant 0 : index
    %13 = vector.load %arg2[%c2, %c0_10, %c0_11] : memref<4x32x64xf32, #tpu.memory_space<vmem>>, vector<1x32x64xf32>
    %14 = vector.shape_cast %13 : vector<1x32x64xf32> to vector<32x64xf32>
    %15 = vector.extract_strided_slice %3 {offsets = [0, 256], sizes = [64, 128], strides = [1, 1]} : vector<64x512xf32> to vector<64x128xf32>
    %cst_12 = arith.constant dense<0.000000e+00> : vector<32x128xf32>
    %16 = tpu.matmul %14, %15, %cst_12 {dimension_numbers = #tpu.dot_dimension_numbers<[1], [0], [0], [1], [0, 0, 1, 1], [], []>} : vector<32x64xf32>, vector<64x128xf32>, vector<32x128xf32> -> vector<32x128xf32>
    %17 = arith.addf %12, %16 : vector<32x128xf32>
    %c3 = arith.constant 3 : index
    %c0_13 = arith.constant 0 : index
    %c0_14 = arith.constant 0 : index
    %18 = vector.load %arg2[%c3, %c0_13, %c0_14] : memref<4x32x64xf32, #tpu.memory_space<vmem>>, vector<1x32x64xf32>
    %19 = vector.shape_cast %18 : vector<1x32x64xf32> to vector<32x64xf32>
    %20 = vector.extract_strided_slice %3 {offsets = [0, 384], sizes = [64, 128], strides = [1, 1]} : vector<64x512xf32> to vector<64x128xf32>
    %cst_15 = arith.constant dense<0.000000e+00> : vector<32x128xf32>
    %21 = tpu.matmul %19, %20, %cst_15 {dimension_numbers = #tpu.dot_dimension_numbers<[1], [0], [0], [1], [0, 0, 1, 1], [], []>} : vector<32x64xf32>, vector<64x128xf32>, vector<32x128xf32> -> vector<32x128xf32>
    %22 = arith.addf %17, %21 : vector<32x128xf32>
    %23 = tpu.iota {dimensions = array<i32: 0>} : vector<128x128xi32>
    %24 = tpu.iota {dimensions = array<i32: 1>} : vector<128x128xi32>
    %c4_i32 = arith.constant 4 : i32
    %25 = vector.broadcast %c4_i32 : i32 to vector<128x128xi32>
    %26 = arith.shrsi %23, %25 : vector<128x128xi32>
    %c4_i32_16 = arith.constant 4 : i32
    %27 = vector.broadcast %c4_i32_16 : i32 to vector<128x128xi32>
    %28 = arith.shrsi %24, %27 : vector<128x128xi32>
    %29 = arith.cmpi eq, %26, %28 : vector<128x128xi32>
    %30 = arith.extui %29 : vector<128x128xi1> to vector<128x128xi32>
    %31 = arith.sitofp %30 : vector<128x128xi32> to vector<128x128xf32>
    %cst_17 = arith.constant dense<0.000000e+00> : vector<32x128xf32>
    %32 = tpu.matmul %22, %31, %cst_17 {dimension_numbers = #tpu.dot_dimension_numbers<[1], [0], [0], [1], [0, 0, 1, 1], [], []>} : vector<32x128xf32>, vector<128x128xf32>, vector<32x128xf32> -> vector<32x128xf32>
    %cst_18 = arith.constant dense<0.000000e+00> : vector<128xf32>
    %33 = vector.multi_reduction <add>, %32, %cst_18 [0] : vector<32x128xf32> to vector<128xf32>
    %34 = vector.shape_cast %33 : vector<128xf32> to vector<1x128xf32>
    %cst_19 = arith.constant 0.001953125 : f32
    %35 = vector.broadcast %cst_19 : f32 to vector<1x128xf32>
    %36 = arith.mulf %34, %35 : vector<1x128xf32>
    %37 = vector.broadcast %36 : vector<1x128xf32> to vector<32x128xf32>
    %38 = arith.subf %22, %37 : vector<32x128xf32>
    %39 = arith.mulf %38, %38 : vector<32x128xf32>
    %cst_20 = arith.constant dense<0.000000e+00> : vector<32x128xf32>
    %40 = tpu.matmul %39, %31, %cst_20 {dimension_numbers = #tpu.dot_dimension_numbers<[1], [0], [0], [1], [0, 0, 1, 1], [], []>} : vector<32x128xf32>, vector<128x128xf32>, vector<32x128xf32> -> vector<32x128xf32>
    %cst_21 = arith.constant dense<0.000000e+00> : vector<128xf32>
    %41 = vector.multi_reduction <add>, %40, %cst_21 [0] : vector<32x128xf32> to vector<128xf32>
    %42 = vector.shape_cast %41 : vector<128xf32> to vector<1x128xf32>
    %cst_22 = arith.constant 0.001953125 : f32
    %43 = vector.broadcast %cst_22 : f32 to vector<1x128xf32>
    %44 = arith.mulf %42, %43 : vector<1x128xf32>
    %c0_23 = arith.constant 0 : index
    %c0_24 = arith.constant 0 : index
    %45 = vector.load %arg3[%c0_23, %c0_24] : memref<1x128xf32, #tpu.memory_space<vmem>>, vector<1x128xf32>
    %cst_25 = arith.constant 9.99999974E-6 : f32
    %46 = vector.broadcast %cst_25 : f32 to vector<1x128xf32>
    %47 = arith.addf %44, %46 : vector<1x128xf32>
    %48 = math.rsqrt %47 : vector<1x128xf32>
    %49 = arith.mulf %45, %48 : vector<1x128xf32>
    %c0_26 = arith.constant 0 : index
    %c0_27 = arith.constant 0 : index
    %50 = vector.load %arg4[%c0_26, %c0_27] : memref<1x128xf32, #tpu.memory_space<vmem>>, vector<1x128xf32>
    %51 = arith.mulf %36, %49 : vector<1x128xf32>
    %52 = arith.subf %50, %51 : vector<1x128xf32>
    %53 = vector.broadcast %49 : vector<1x128xf32> to vector<32x128xf32>
    %54 = arith.mulf %22, %53 : vector<32x128xf32>
    %55 = vector.broadcast %52 : vector<1x128xf32> to vector<32x128xf32>
    %56 = arith.addf %54, %55 : vector<32x128xf32>
    %cst_28 = arith.constant 0.000000e+00 : f32
    %57 = vector.broadcast %cst_28 : f32 to vector<32x128xf32>
    %58 = arith.maximumf %56, %57 : vector<32x128xf32>
    %59 = arith.truncf %58 : vector<32x128xf32> to vector<32x128xbf16>
    %c0_29 = arith.constant 0 : index
    %c0_30 = arith.constant 0 : index
    %60 = vector.load %arg5[%c0_29, %c0_30] : memref<128x512xbf16, #tpu.memory_space<vmem>>, vector<128x512xbf16>
    %cst_31 = arith.constant dense<0.000000e+00> : vector<32x512xf32>
    %61 = tpu.matmul %59, %60, %cst_31 {dimension_numbers = #tpu.dot_dimension_numbers<[1], [0], [0], [1], [0, 0, 1, 1], [], []>} : vector<32x128xbf16>, vector<128x512xbf16>, vector<32x512xf32> -> vector<32x512xf32>
    %c0_32 = arith.constant 0 : index
    %c0_33 = arith.constant 0 : index
    %c0_34 = arith.constant 0 : index
    %62 = vector.load %arg6[%c0_32, %c0_33, %c0_34] : memref<4x16x32xf32, #tpu.memory_space<vmem>>, vector<1x16x32xf32>
    %63 = vector.shape_cast %62 : vector<1x16x32xf32> to vector<16x32xf32>
    %64 = vector.extract_strided_slice %61 {offsets = [0, 0], sizes = [32, 128], strides = [1, 1]} : vector<32x512xf32> to vector<32x128xf32>
    %cst_35 = arith.constant dense<0.000000e+00> : vector<16x128xf32>
    %65 = tpu.matmul %63, %64, %cst_35 {dimension_numbers = #tpu.dot_dimension_numbers<[1], [0], [0], [1], [0, 0, 1, 1], [], []>} : vector<16x32xf32>, vector<32x128xf32>, vector<16x128xf32> -> vector<16x128xf32>
    %c1_36 = arith.constant 1 : index
    %c0_37 = arith.constant 0 : index
    %c0_38 = arith.constant 0 : index
    %66 = vector.load %arg6[%c1_36, %c0_37, %c0_38] : memref<4x16x32xf32, #tpu.memory_space<vmem>>, vector<1x16x32xf32>
    %67 = vector.shape_cast %66 : vector<1x16x32xf32> to vector<16x32xf32>
    %68 = vector.extract_strided_slice %61 {offsets = [0, 128], sizes = [32, 128], strides = [1, 1]} : vector<32x512xf32> to vector<32x128xf32>
    %cst_39 = arith.constant dense<0.000000e+00> : vector<16x128xf32>
    %69 = tpu.matmul %67, %68, %cst_39 {dimension_numbers = #tpu.dot_dimension_numbers<[1], [0], [0], [1], [0, 0, 1, 1], [], []>} : vector<16x32xf32>, vector<32x128xf32>, vector<16x128xf32> -> vector<16x128xf32>
    %70 = arith.addf %65, %69 : vector<16x128xf32>
    %c2_40 = arith.constant 2 : index
    %c0_41 = arith.constant 0 : index
    %c0_42 = arith.constant 0 : index
    %71 = vector.load %arg6[%c2_40, %c0_41, %c0_42] : memref<4x16x32xf32, #tpu.memory_space<vmem>>, vector<1x16x32xf32>
    %72 = vector.shape_cast %71 : vector<1x16x32xf32> to vector<16x32xf32>
    %73 = vector.extract_strided_slice %61 {offsets = [0, 256], sizes = [32, 128], strides = [1, 1]} : vector<32x512xf32> to vector<32x128xf32>
    %cst_43 = arith.constant dense<0.000000e+00> : vector<16x128xf32>
    %74 = tpu.matmul %72, %73, %cst_43 {dimension_numbers = #tpu.dot_dimension_numbers<[1], [0], [0], [1], [0, 0, 1, 1], [], []>} : vector<16x32xf32>, vector<32x128xf32>, vector<16x128xf32> -> vector<16x128xf32>
    %75 = arith.addf %70, %74 : vector<16x128xf32>
    %c3_44 = arith.constant 3 : index
    %c0_45 = arith.constant 0 : index
    %c0_46 = arith.constant 0 : index
    %76 = vector.load %arg6[%c3_44, %c0_45, %c0_46] : memref<4x16x32xf32, #tpu.memory_space<vmem>>, vector<1x16x32xf32>
    %77 = vector.shape_cast %76 : vector<1x16x32xf32> to vector<16x32xf32>
    %78 = vector.extract_strided_slice %61 {offsets = [0, 384], sizes = [32, 128], strides = [1, 1]} : vector<32x512xf32> to vector<32x128xf32>
    %cst_47 = arith.constant dense<0.000000e+00> : vector<16x128xf32>
    %79 = tpu.matmul %77, %78, %cst_47 {dimension_numbers = #tpu.dot_dimension_numbers<[1], [0], [0], [1], [0, 0, 1, 1], [], []>} : vector<16x32xf32>, vector<32x128xf32>, vector<16x128xf32> -> vector<16x128xf32>
    %80 = arith.addf %75, %79 : vector<16x128xf32>
    %81 = tpu.iota {dimensions = array<i32: 0>} : vector<128x128xi32>
    %82 = tpu.iota {dimensions = array<i32: 1>} : vector<128x128xi32>
    %c3_i32 = arith.constant 3 : i32
    %83 = vector.broadcast %c3_i32 : i32 to vector<128x128xi32>
    %84 = arith.shrsi %81, %83 : vector<128x128xi32>
    %c3_i32_48 = arith.constant 3 : i32
    %85 = vector.broadcast %c3_i32_48 : i32 to vector<128x128xi32>
    %86 = arith.shrsi %82, %85 : vector<128x128xi32>
    %87 = arith.cmpi eq, %84, %86 : vector<128x128xi32>
    %88 = arith.extui %87 : vector<128x128xi1> to vector<128x128xi32>
    %89 = arith.sitofp %88 : vector<128x128xi32> to vector<128x128xf32>
    %cst_49 = arith.constant dense<0.000000e+00> : vector<16x128xf32>
    %90 = tpu.matmul %80, %89, %cst_49 {dimension_numbers = #tpu.dot_dimension_numbers<[1], [0], [0], [1], [0, 0, 1, 1], [], []>} : vector<16x128xf32>, vector<128x128xf32>, vector<16x128xf32> -> vector<16x128xf32>
    %cst_50 = arith.constant dense<0.000000e+00> : vector<128xf32>
    %91 = vector.multi_reduction <add>, %90, %cst_50 [0] : vector<16x128xf32> to vector<128xf32>
    %92 = vector.shape_cast %91 : vector<128xf32> to vector<1x128xf32>
    %cst_51 = arith.constant 7.812500e-03 : f32
    %93 = vector.broadcast %cst_51 : f32 to vector<1x128xf32>
    %94 = arith.mulf %92, %93 : vector<1x128xf32>
    %95 = vector.broadcast %94 : vector<1x128xf32> to vector<16x128xf32>
    %96 = arith.subf %80, %95 : vector<16x128xf32>
    %97 = arith.mulf %96, %96 : vector<16x128xf32>
    %cst_52 = arith.constant dense<0.000000e+00> : vector<16x128xf32>
    %98 = tpu.matmul %97, %89, %cst_52 {dimension_numbers = #tpu.dot_dimension_numbers<[1], [0], [0], [1], [0, 0, 1, 1], [], []>} : vector<16x128xf32>, vector<128x128xf32>, vector<16x128xf32> -> vector<16x128xf32>
    %cst_53 = arith.constant dense<0.000000e+00> : vector<128xf32>
    %99 = vector.multi_reduction <add>, %98, %cst_53 [0] : vector<16x128xf32> to vector<128xf32>
    %100 = vector.shape_cast %99 : vector<128xf32> to vector<1x128xf32>
    %cst_54 = arith.constant 7.812500e-03 : f32
    %101 = vector.broadcast %cst_54 : f32 to vector<1x128xf32>
    %102 = arith.mulf %100, %101 : vector<1x128xf32>
    %c0_55 = arith.constant 0 : index
    %c0_56 = arith.constant 0 : index
    %103 = vector.load %arg7[%c0_55, %c0_56] : memref<1x128xf32, #tpu.memory_space<vmem>>, vector<1x128xf32>
    %cst_57 = arith.constant 9.99999974E-6 : f32
    %104 = vector.broadcast %cst_57 : f32 to vector<1x128xf32>
    %105 = arith.addf %102, %104 : vector<1x128xf32>
    %106 = math.rsqrt %105 : vector<1x128xf32>
    %107 = arith.mulf %103, %106 : vector<1x128xf32>
    %c0_58 = arith.constant 0 : index
    %c0_59 = arith.constant 0 : index
    %108 = vector.load %arg8[%c0_58, %c0_59] : memref<1x128xf32, #tpu.memory_space<vmem>>, vector<1x128xf32>
    %109 = arith.mulf %94, %107 : vector<1x128xf32>
    %110 = arith.subf %108, %109 : vector<1x128xf32>
    %111 = vector.broadcast %107 : vector<1x128xf32> to vector<16x128xf32>
    %112 = arith.mulf %80, %111 : vector<16x128xf32>
    %113 = vector.broadcast %110 : vector<1x128xf32> to vector<16x128xf32>
    %114 = arith.addf %112, %113 : vector<16x128xf32>
    %cst_60 = arith.constant 0.000000e+00 : f32
    %115 = vector.broadcast %cst_60 : f32 to vector<16x128xf32>
    %116 = arith.maximumf %114, %115 : vector<16x128xf32>
    %117 = arith.truncf %116 : vector<16x128xf32> to vector<16x128xbf16>
    %c0_61 = arith.constant 0 : index
    %c0_62 = arith.constant 0 : index
    %118 = vector.load %arg9[%c0_61, %c0_62] : memref<128x384xbf16, #tpu.memory_space<vmem>>, vector<128x384xbf16>
    %cst_63 = arith.constant dense<0.000000e+00> : vector<16x384xf32>
    %119 = tpu.matmul %117, %118, %cst_63 {dimension_numbers = #tpu.dot_dimension_numbers<[1], [0], [0], [1], [0, 0, 1, 1], [], []>} : vector<16x128xbf16>, vector<128x384xbf16>, vector<16x384xf32> -> vector<16x384xf32>
    %c0_64 = arith.constant 0 : index
    %c0_65 = arith.constant 0 : index
    %c0_66 = arith.constant 0 : index
    %120 = vector.load %arg10[%c0_64, %c0_65, %c0_66] : memref<3x16x16xf32, #tpu.memory_space<vmem>>, vector<1x16x16xf32>
    %121 = vector.shape_cast %120 : vector<1x16x16xf32> to vector<16x16xf32>
    %122 = vector.extract_strided_slice %119 {offsets = [0, 0], sizes = [16, 128], strides = [1, 1]} : vector<16x384xf32> to vector<16x128xf32>
    %cst_67 = arith.constant dense<0.000000e+00> : vector<16x128xf32>
    %123 = tpu.matmul %121, %122, %cst_67 {dimension_numbers = #tpu.dot_dimension_numbers<[1], [0], [0], [1], [0, 0, 1, 1], [], []>} : vector<16x16xf32>, vector<16x128xf32>, vector<16x128xf32> -> vector<16x128xf32>
    %c1_68 = arith.constant 1 : index
    %c0_69 = arith.constant 0 : index
    %c0_70 = arith.constant 0 : index
    %124 = vector.load %arg10[%c1_68, %c0_69, %c0_70] : memref<3x16x16xf32, #tpu.memory_space<vmem>>, vector<1x16x16xf32>
    %125 = vector.shape_cast %124 : vector<1x16x16xf32> to vector<16x16xf32>
    %126 = vector.extract_strided_slice %119 {offsets = [0, 128], sizes = [16, 128], strides = [1, 1]} : vector<16x384xf32> to vector<16x128xf32>
    %cst_71 = arith.constant dense<0.000000e+00> : vector<16x128xf32>
    %127 = tpu.matmul %125, %126, %cst_71 {dimension_numbers = #tpu.dot_dimension_numbers<[1], [0], [0], [1], [0, 0, 1, 1], [], []>} : vector<16x16xf32>, vector<16x128xf32>, vector<16x128xf32> -> vector<16x128xf32>
    %128 = arith.addf %123, %127 : vector<16x128xf32>
    %c2_72 = arith.constant 2 : index
    %c0_73 = arith.constant 0 : index
    %c0_74 = arith.constant 0 : index
    %129 = vector.load %arg10[%c2_72, %c0_73, %c0_74] : memref<3x16x16xf32, #tpu.memory_space<vmem>>, vector<1x16x16xf32>
    %130 = vector.shape_cast %129 : vector<1x16x16xf32> to vector<16x16xf32>
    %131 = vector.extract_strided_slice %119 {offsets = [0, 256], sizes = [16, 128], strides = [1, 1]} : vector<16x384xf32> to vector<16x128xf32>
    %cst_75 = arith.constant dense<0.000000e+00> : vector<16x128xf32>
    %132 = tpu.matmul %130, %131, %cst_75 {dimension_numbers = #tpu.dot_dimension_numbers<[1], [0], [0], [1], [0, 0, 1, 1], [], []>} : vector<16x16xf32>, vector<16x128xf32>, vector<16x128xf32> -> vector<16x128xf32>
    %133 = arith.addf %128, %132 : vector<16x128xf32>
    %cst_76 = arith.constant dense<0.000000e+00> : vector<16x128xf32>
    %134 = tpu.matmul %133, %89, %cst_76 {dimension_numbers = #tpu.dot_dimension_numbers<[1], [0], [0], [1], [0, 0, 1, 1], [], []>} : vector<16x128xf32>, vector<128x128xf32>, vector<16x128xf32> -> vector<16x128xf32>
    %cst_77 = arith.constant dense<0.000000e+00> : vector<128xf32>
    %135 = vector.multi_reduction <add>, %134, %cst_77 [0] : vector<16x128xf32> to vector<128xf32>
    %136 = vector.shape_cast %135 : vector<128xf32> to vector<1x128xf32>
    %cst_78 = arith.constant 7.812500e-03 : f32
    %137 = vector.broadcast %cst_78 : f32 to vector<1x128xf32>
    %138 = arith.mulf %136, %137 : vector<1x128xf32>
    %139 = vector.broadcast %138 : vector<1x128xf32> to vector<16x128xf32>
    %140 = arith.subf %133, %139 : vector<16x128xf32>
    %141 = arith.mulf %140, %140 : vector<16x128xf32>
    %cst_79 = arith.constant dense<0.000000e+00> : vector<16x128xf32>
    %142 = tpu.matmul %141, %89, %cst_79 {dimension_numbers = #tpu.dot_dimension_numbers<[1], [0], [0], [1], [0, 0, 1, 1], [], []>} : vector<16x128xf32>, vector<128x128xf32>, vector<16x128xf32> -> vector<16x128xf32>
    %cst_80 = arith.constant dense<0.000000e+00> : vector<128xf32>
    %143 = vector.multi_reduction <add>, %142, %cst_80 [0] : vector<16x128xf32> to vector<128xf32>
    %144 = vector.shape_cast %143 : vector<128xf32> to vector<1x128xf32>
    %cst_81 = arith.constant 7.812500e-03 : f32
    %145 = vector.broadcast %cst_81 : f32 to vector<1x128xf32>
    %146 = arith.mulf %144, %145 : vector<1x128xf32>
    %c0_82 = arith.constant 0 : index
    %c0_83 = arith.constant 0 : index
    %147 = vector.load %arg11[%c0_82, %c0_83] : memref<1x128xf32, #tpu.memory_space<vmem>>, vector<1x128xf32>
    %cst_84 = arith.constant 9.99999974E-6 : f32
    %148 = vector.broadcast %cst_84 : f32 to vector<1x128xf32>
    %149 = arith.addf %146, %148 : vector<1x128xf32>
    %150 = math.rsqrt %149 : vector<1x128xf32>
    %151 = arith.mulf %147, %150 : vector<1x128xf32>
    %c0_85 = arith.constant 0 : index
    %c0_86 = arith.constant 0 : index
    %152 = vector.load %arg12[%c0_85, %c0_86] : memref<1x128xf32, #tpu.memory_space<vmem>>, vector<1x128xf32>
    %153 = arith.mulf %138, %151 : vector<1x128xf32>
    %154 = arith.subf %152, %153 : vector<1x128xf32>
    %155 = vector.broadcast %151 : vector<1x128xf32> to vector<16x128xf32>
    %156 = arith.mulf %133, %155 : vector<16x128xf32>
    %157 = vector.broadcast %154 : vector<1x128xf32> to vector<16x128xf32>
    %158 = arith.addf %156, %157 : vector<16x128xf32>
    %159 = arith.addf %116, %158 : vector<16x128xf32>
    %cst_87 = arith.constant 0.000000e+00 : f32
    %160 = vector.broadcast %cst_87 : f32 to vector<16x128xf32>
    %161 = arith.maximumf %159, %160 : vector<16x128xf32>
    %162 = arith.truncf %161 : vector<16x128xf32> to vector<16x128xbf16>
    %c0_88 = arith.constant 0 : index
    %c0_89 = arith.constant 0 : index
    %163 = vector.load %arg13[%c0_88, %c0_89] : memref<128x512xbf16, #tpu.memory_space<vmem>>, vector<128x512xbf16>
    %cst_90 = arith.constant dense<0.000000e+00> : vector<16x512xf32>
    %164 = tpu.matmul %162, %163, %cst_90 {dimension_numbers = #tpu.dot_dimension_numbers<[1], [0], [0], [1], [0, 0, 1, 1], [], []>} : vector<16x128xbf16>, vector<128x512xbf16>, vector<16x512xf32> -> vector<16x512xf32>
    %c0_91 = arith.constant 0 : index
    %c0_92 = arith.constant 0 : index
    %c0_93 = arith.constant 0 : index
    %165 = vector.load %arg14[%c0_91, %c0_92, %c0_93] : memref<4x32x16xf32, #tpu.memory_space<vmem>>, vector<1x32x16xf32>
    %166 = vector.shape_cast %165 : vector<1x32x16xf32> to vector<32x16xf32>
    %167 = vector.extract_strided_slice %164 {offsets = [0, 0], sizes = [16, 128], strides = [1, 1]} : vector<16x512xf32> to vector<16x128xf32>
    %cst_94 = arith.constant dense<0.000000e+00> : vector<32x128xf32>
    %168 = tpu.matmul %166, %167, %cst_94 {dimension_numbers = #tpu.dot_dimension_numbers<[1], [0], [0], [1], [0, 0, 1, 1], [], []>} : vector<32x16xf32>, vector<16x128xf32>, vector<32x128xf32> -> vector<32x128xf32>
    %c1_95 = arith.constant 1 : index
    %c0_96 = arith.constant 0 : index
    %c0_97 = arith.constant 0 : index
    %169 = vector.load %arg14[%c1_95, %c0_96, %c0_97] : memref<4x32x16xf32, #tpu.memory_space<vmem>>, vector<1x32x16xf32>
    %170 = vector.shape_cast %169 : vector<1x32x16xf32> to vector<32x16xf32>
    %171 = vector.extract_strided_slice %164 {offsets = [0, 128], sizes = [16, 128], strides = [1, 1]} : vector<16x512xf32> to vector<16x128xf32>
    %cst_98 = arith.constant dense<0.000000e+00> : vector<32x128xf32>
    %172 = tpu.matmul %170, %171, %cst_98 {dimension_numbers = #tpu.dot_dimension_numbers<[1], [0], [0], [1], [0, 0, 1, 1], [], []>} : vector<32x16xf32>, vector<16x128xf32>, vector<32x128xf32> -> vector<32x128xf32>
    %173 = arith.addf %168, %172 : vector<32x128xf32>
    %c2_99 = arith.constant 2 : index
    %c0_100 = arith.constant 0 : index
    %c0_101 = arith.constant 0 : index
    %174 = vector.load %arg14[%c2_99, %c0_100, %c0_101] : memref<4x32x16xf32, #tpu.memory_space<vmem>>, vector<1x32x16xf32>
    %175 = vector.shape_cast %174 : vector<1x32x16xf32> to vector<32x16xf32>
    %176 = vector.extract_strided_slice %164 {offsets = [0, 256], sizes = [16, 128], strides = [1, 1]} : vector<16x512xf32> to vector<16x128xf32>
    %cst_102 = arith.constant dense<0.000000e+00> : vector<32x128xf32>
    %177 = tpu.matmul %175, %176, %cst_102 {dimension_numbers = #tpu.dot_dimension_numbers<[1], [0], [0], [1], [0, 0, 1, 1], [], []>} : vector<32x16xf32>, vector<16x128xf32>, vector<32x128xf32> -> vector<32x128xf32>
    %178 = arith.addf %173, %177 : vector<32x128xf32>
    %c3_103 = arith.constant 3 : index
    %c0_104 = arith.constant 0 : index
    %c0_105 = arith.constant 0 : index
    %179 = vector.load %arg14[%c3_103, %c0_104, %c0_105] : memref<4x32x16xf32, #tpu.memory_space<vmem>>, vector<1x32x16xf32>
    %180 = vector.shape_cast %179 : vector<1x32x16xf32> to vector<32x16xf32>
    %181 = vector.extract_strided_slice %164 {offsets = [0, 384], sizes = [16, 128], strides = [1, 1]} : vector<16x512xf32> to vector<16x128xf32>
    %cst_106 = arith.constant dense<0.000000e+00> : vector<32x128xf32>
    %182 = tpu.matmul %180, %181, %cst_106 {dimension_numbers = #tpu.dot_dimension_numbers<[1], [0], [0], [1], [0, 0, 1, 1], [], []>} : vector<32x16xf32>, vector<16x128xf32>, vector<32x128xf32> -> vector<32x128xf32>
    %183 = arith.addf %178, %182 : vector<32x128xf32>
    %cst_107 = arith.constant dense<0.000000e+00> : vector<32x128xf32>
    %184 = tpu.matmul %183, %31, %cst_107 {dimension_numbers = #tpu.dot_dimension_numbers<[1], [0], [0], [1], [0, 0, 1, 1], [], []>} : vector<32x128xf32>, vector<128x128xf32>, vector<32x128xf32> -> vector<32x128xf32>
    %cst_108 = arith.constant dense<0.000000e+00> : vector<128xf32>
    %185 = vector.multi_reduction <add>, %184, %cst_108 [0] : vector<32x128xf32> to vector<128xf32>
    %186 = vector.shape_cast %185 : vector<128xf32> to vector<1x128xf32>
    %cst_109 = arith.constant 0.001953125 : f32
    %187 = vector.broadcast %cst_109 : f32 to vector<1x128xf32>
    %188 = arith.mulf %186, %187 : vector<1x128xf32>
    %189 = vector.broadcast %188 : vector<1x128xf32> to vector<32x128xf32>
    %190 = arith.subf %183, %189 : vector<32x128xf32>
    %191 = arith.mulf %190, %190 : vector<32x128xf32>
    %cst_110 = arith.constant dense<0.000000e+00> : vector<32x128xf32>
    %192 = tpu.matmul %191, %31, %cst_110 {dimension_numbers = #tpu.dot_dimension_numbers<[1], [0], [0], [1], [0, 0, 1, 1], [], []>} : vector<32x128xf32>, vector<128x128xf32>, vector<32x128xf32> -> vector<32x128xf32>
    %cst_111 = arith.constant dense<0.000000e+00> : vector<128xf32>
    %193 = vector.multi_reduction <add>, %192, %cst_111 [0] : vector<32x128xf32> to vector<128xf32>
    %194 = vector.shape_cast %193 : vector<128xf32> to vector<1x128xf32>
    %cst_112 = arith.constant 0.001953125 : f32
    %195 = vector.broadcast %cst_112 : f32 to vector<1x128xf32>
    %196 = arith.mulf %194, %195 : vector<1x128xf32>
    %c0_113 = arith.constant 0 : index
    %c0_114 = arith.constant 0 : index
    %197 = vector.load %arg15[%c0_113, %c0_114] : memref<1x128xf32, #tpu.memory_space<vmem>>, vector<1x128xf32>
    %cst_115 = arith.constant 9.99999974E-6 : f32
    %198 = vector.broadcast %cst_115 : f32 to vector<1x128xf32>
    %199 = arith.addf %196, %198 : vector<1x128xf32>
    %200 = math.rsqrt %199 : vector<1x128xf32>
    %201 = arith.mulf %197, %200 : vector<1x128xf32>
    %c0_116 = arith.constant 0 : index
    %c0_117 = arith.constant 0 : index
    %202 = vector.load %arg16[%c0_116, %c0_117] : memref<1x128xf32, #tpu.memory_space<vmem>>, vector<1x128xf32>
    %203 = arith.mulf %188, %201 : vector<1x128xf32>
    %204 = arith.subf %202, %203 : vector<1x128xf32>
    %205 = vector.broadcast %201 : vector<1x128xf32> to vector<32x128xf32>
    %206 = arith.mulf %183, %205 : vector<32x128xf32>
    %207 = vector.broadcast %204 : vector<1x128xf32> to vector<32x128xf32>
    %208 = arith.addf %206, %207 : vector<32x128xf32>
    %cst_118 = arith.constant 0.000000e+00 : f32
    %209 = vector.broadcast %cst_118 : f32 to vector<32x128xf32>
    %210 = arith.maximumf %208, %209 : vector<32x128xf32>
    %211 = arith.truncf %210 : vector<32x128xf32> to vector<32x128xbf16>
    %c0_119 = arith.constant 0 : index
    %c0_120 = arith.constant 0 : index
    %212 = vector.load %arg17[%c0_119, %c0_120] : memref<128x512xbf16, #tpu.memory_space<vmem>>, vector<128x512xbf16>
    %cst_121 = arith.constant dense<0.000000e+00> : vector<32x512xf32>
    %213 = tpu.matmul %211, %212, %cst_121 {dimension_numbers = #tpu.dot_dimension_numbers<[1], [0], [0], [1], [0, 0, 1, 1], [], []>} : vector<32x128xbf16>, vector<128x512xbf16>, vector<32x512xf32> -> vector<32x512xf32>
    %c0_122 = arith.constant 0 : index
    %c0_123 = arith.constant 0 : index
    %c0_124 = arith.constant 0 : index
    %214 = vector.load %arg18[%c0_122, %c0_123, %c0_124] : memref<4x64x32xf32, #tpu.memory_space<vmem>>, vector<1x64x32xf32>
    %215 = vector.shape_cast %214 : vector<1x64x32xf32> to vector<64x32xf32>
    %216 = vector.extract_strided_slice %213 {offsets = [0, 0], sizes = [32, 128], strides = [1, 1]} : vector<32x512xf32> to vector<32x128xf32>
    %cst_125 = arith.constant dense<0.000000e+00> : vector<64x128xf32>
    %217 = tpu.matmul %215, %216, %cst_125 {dimension_numbers = #tpu.dot_dimension_numbers<[1], [0], [0], [1], [0, 0, 1, 1], [], []>} : vector<64x32xf32>, vector<32x128xf32>, vector<64x128xf32> -> vector<64x128xf32>
    %c1_126 = arith.constant 1 : index
    %c0_127 = arith.constant 0 : index
    %c0_128 = arith.constant 0 : index
    %218 = vector.load %arg18[%c1_126, %c0_127, %c0_128] : memref<4x64x32xf32, #tpu.memory_space<vmem>>, vector<1x64x32xf32>
    %219 = vector.shape_cast %218 : vector<1x64x32xf32> to vector<64x32xf32>
    %220 = vector.extract_strided_slice %213 {offsets = [0, 128], sizes = [32, 128], strides = [1, 1]} : vector<32x512xf32> to vector<32x128xf32>
    %cst_129 = arith.constant dense<0.000000e+00> : vector<64x128xf32>
    %221 = tpu.matmul %219, %220, %cst_129 {dimension_numbers = #tpu.dot_dimension_numbers<[1], [0], [0], [1], [0, 0, 1, 1], [], []>} : vector<64x32xf32>, vector<32x128xf32>, vector<64x128xf32> -> vector<64x128xf32>
    %222 = arith.addf %217, %221 : vector<64x128xf32>
    %c2_130 = arith.constant 2 : index
    %c0_131 = arith.constant 0 : index
    %c0_132 = arith.constant 0 : index
    %223 = vector.load %arg18[%c2_130, %c0_131, %c0_132] : memref<4x64x32xf32, #tpu.memory_space<vmem>>, vector<1x64x32xf32>
    %224 = vector.shape_cast %223 : vector<1x64x32xf32> to vector<64x32xf32>
    %225 = vector.extract_strided_slice %213 {offsets = [0, 256], sizes = [32, 128], strides = [1, 1]} : vector<32x512xf32> to vector<32x128xf32>
    %cst_133 = arith.constant dense<0.000000e+00> : vector<64x128xf32>
    %226 = tpu.matmul %224, %225, %cst_133 {dimension_numbers = #tpu.dot_dimension_numbers<[1], [0], [0], [1], [0, 0, 1, 1], [], []>} : vector<64x32xf32>, vector<32x128xf32>, vector<64x128xf32> -> vector<64x128xf32>
    %227 = arith.addf %222, %226 : vector<64x128xf32>
    %c3_134 = arith.constant 3 : index
    %c0_135 = arith.constant 0 : index
    %c0_136 = arith.constant 0 : index
    %228 = vector.load %arg18[%c3_134, %c0_135, %c0_136] : memref<4x64x32xf32, #tpu.memory_space<vmem>>, vector<1x64x32xf32>
    %229 = vector.shape_cast %228 : vector<1x64x32xf32> to vector<64x32xf32>
    %230 = vector.extract_strided_slice %213 {offsets = [0, 384], sizes = [32, 128], strides = [1, 1]} : vector<32x512xf32> to vector<32x128xf32>
    %cst_137 = arith.constant dense<0.000000e+00> : vector<64x128xf32>
    %231 = tpu.matmul %229, %230, %cst_137 {dimension_numbers = #tpu.dot_dimension_numbers<[1], [0], [0], [1], [0, 0, 1, 1], [], []>} : vector<64x32xf32>, vector<32x128xf32>, vector<64x128xf32> -> vector<64x128xf32>
    %232 = arith.addf %227, %231 : vector<64x128xf32>
    %233 = math.tanh %232 : vector<64x128xf32>
    %c0_138 = arith.constant 0 : index
    %c0_139 = arith.constant 0 : index
    %234 = vector.load %arg19[%c0_138, %c0_139] : memref<64x128xf32, #tpu.memory_space<vmem>>, vector<64x128xf32>
    tpu.vector_store %arg19[%c0_138, %c0_139], %233 {strides = array<i32>} : memref<64x128xf32, #tpu.memory_space<vmem>>, vector<64x128xf32>,
    return
  }
}

</mosaic_0001>

<bundles_post_ra>
// kernel: forward.1
= control target key start
LH: loop header
LB: loop body
LE: loop exit
PB: predicated region body
PF: predicated region fallthrough
CT: control target
= control target key end

     0   :  { %v6624_v1 = vmov 0   ;;  %vm422_vm0 = vcmask 523264   ;;  %v829_v46 = vlaneseq  ;;  %s8253_s1 = inlined_call_operand.vmem [shape: bf16[128,512], index: 1, kind: input, shape index: {}]   ;;  %s8254_s0 = inlined_call_operand.vmem [shape: f32[64,128], index: 0, kind: input, shape index: {}]   ;;  %s8255_s2 = inlined_call_operand.vmem [shape: f32[4,32,64], index: 2, kind: input, shape index: {}]   ;;  %s8256_s5 = inlined_call_operand.vmem [shape: bf16[128,512], index: 5, kind: input, shape index: {}]   ;;  %s8257_s3 = inlined_call_operand.vmem [shape: f32[1,128], index: 3, kind: input, shape index: {}, may-alias: {3,7,11,15}]   ;;  %s8258_s4 = inlined_call_operand.vmem [shape: f32[1,128], index: 4, kind: input, shape index: {}, may-alias: {4,8,12,16}]   ;;  %s8259_s6 = inlined_call_operand.vmem [shape: f32[4,16,32], index: 6, kind: input, shape index: {}]   ;;  %s8260_s9 = inlined_call_operand.vmem [shape: bf16[128,384], index: 9, kind: input, shape index: {}]   ;;  %s8261_s7 = inlined_call_operand.vmem [shape: f32[1,128], index: 7, kind: input, shape index: {}, may-alias: {3,7,11,15}]   ;;  %s8262_s8 = inlined_call_operand.vmem [shape: f32[1,128], index: 8, kind: input, shape index: {}, may-alias: {4,8,12,16}]   ;;  %s8263_s10 = inlined_call_operand.vmem [shape: f32[3,16,16], index: 10, kind: input, shape index: {}]   ;;  %s8264_s13 = inlined_call_operand.vmem [shape: bf16[128,512], index: 13, kind: input, shape index: {}]   ;;  %s8265_s11 = inlined_call_operand.vmem [shape: f32[1,128], index: 11, kind: input, shape index: {}, may-alias: {3,7,11,15}]   ;;  %s8266_s12 = inlined_call_operand.vmem [shape: f32[1,128], index: 12, kind: input, shape index: {}, may-alias: {4,8,12,16}]   ;;  %s8267_s14 = inlined_call_operand.vmem [shape: f32[4,32,16], index: 14, kind: input, shape index: {}]   ;;  %s8268_s17 = inlined_call_operand.vmem [shape: bf16[128,512], index: 17, kind: input, shape index: {}]   ;;  %s8269_s15 = inlined_call_operand.vmem [shape: f32[1,128], index: 15, kind: input, shape index: {}, may-alias: {3,7,11,15}]   ;;  %s8270_s16 = inlined_call_operand.vmem [shape: f32[1,128], index: 16, kind: input, shape index: {}, may-alias: {4,8,12,16}]   ;;  %s8271_s18 = inlined_call_operand.vmem [shape: f32[4,64,32], index: 18, kind: input, shape index: {}]   ;;  %s8272_s19 = inlined_call_operand.vmem [shape: f32[64,128], index: 19, kind: output, shape index: {}]  }
   0x1   :  { %8286 = sst [smem:[#allocation2_spill]] %s8253_s1  ;;  %299 = vmatprep.mubr.bf16.mxu0 %v6624_v1  ;;  %372 = vmatprep.mubr.bf16.mxu1 %v6624_v1 }
   0x2   :  { %8287 = sst [smem:[#allocation3_spill]] %s8254_s0  ;;  %s8290_s20 = sld [smem:[#allocation2_spill]]  ;;  %v6860_v47 = vshrl.u32 %v829_v46, 7  ;;  %v6862_v48 = vand.u32 127, %v829_v46 }
   0x3   :  { %8288 = sst [smem:[#allocation4_spill]] %s8255_s2  ;;  %s8291_s28 = sld [smem:[#allocation3_spill]] }
   0x4   :  { %8289 = sst [smem:[#allocation5_spill]] %s8256_s5  ;;  %s8292_s1 = sld [smem:[#allocation4_spill]]  ;;  %v6865_v49 = vadd.s32 8, %v6860_v47  ;;  %v848_v50 = vshra.s32 %v6860_v47, 4  ;;  %v6869_v51 = vshra.s32 %v6862_v48, 4  ;;  %v6872_v52 = vadd.s32 16, %v6860_v47 }
   0x5   :  { %v6875_v53 = vadd.s32 24, %v6860_v47  ;;  %v6878_v54 = vadd.s32 32, %v6860_v47  ;;  %v6881_v55 = vadd.s32 40, %v6860_v47  ;;  %v6884_v56 = vadd.s32 48, %v6860_v47  ;;  %s8309_s0 = sld [smem:[#allocation5_spill]] }
   0x6   :  { %v849_v57 = vshra.s32 %v6865_v49, 4  ;;  %vm865_vm1 = vcmp.eq.s32.totalorder %v848_v50, %v6869_v51  ;;  %v850_v58 = vshra.s32 %v6872_v52, 4  ;;  %v6890_v59 = vadd.s32 56, %v6860_v47 }
   0x7   :  { %v851_v60 = vshra.s32 %v6875_v53, 4  ;;  %v852_v61 = vshra.s32 %v6878_v54, 4  ;;  %v853_v62 = vshra.s32 %v6881_v55, 4 }
   0x8   :  { %v6376_v0 = vld [vmem:[%s8290_s20 + $0x4] ss:$16 sps:$4 sm:$0xff]   ;;  %v6378_v2 = vld [vmem:[%s8290_s20] ss:$16 sps:$4 sm:$0xff]   ;;  %v6400_v9 = vld [vmem:[%s8290_s20 + $0xc] ss:$16 sps:$4 sm:$0xff]   ;;  %vm866_vm2 = vcmp.eq.s32.totalorder %v849_v57, %v6869_v51  ;;  %vm867_vm3 = vcmp.eq.s32.totalorder %v850_v58, %v6869_v51 }
   0x9   :  { %267 = vmatprep.subr.bf16.mxu0 %v6376_v0  ;;  %v6379_v3 = vld [vmem:[%s8290_s20 + $0x24] ss:$16 sps:$4 sm:$0xff]   ;;  %v6381_v4 = vld [vmem:[%s8290_s20 + $0x20] ss:$16 sps:$4 sm:$0xff]   ;;  %v6402_v10 = vld [vmem:[%s8290_s20 + $0x8] ss:$16 sps:$4 sm:$0xff]   ;;  %340 = vmatprep.subr.bf16.mxu1 %v6400_v9  ;;  %vm868_vm5 = vcmp.eq.s32.totalorder %v851_v60, %v6869_v51  ;;  %vm869_vm7 = vcmp.eq.s32.totalorder %v852_v61, %v6869_v51  ;;  %vm870_vm8 = vcmp.eq.s32.totalorder %v853_v62, %v6869_v51 }
   0xa   :  { %268 = vmatpush1.bf16.msra.mxu0 %v6378_v2  ;;  %v6382_v5 = vld [vmem:[%s8290_s20 + $0x44] ss:$16 sps:$4 sm:$0xff]   ;;  %v6384_v6 = vld [vmem:[%s8290_s20 + $0x40] ss:$16 sps:$4 sm:$0xff]   ;;  %v6403_v12 = vld [vmem:[%s8290_s20 + $0x2c] ss:$16 sps:$4 sm:$0xff]   ;;  %341 = vmatpush1.bf16.msra.mxu1 %v6402_v10 }
   0xb   :  { %269 = vmatprep.subr.bf16.mxu0 %v6379_v3  ;;  %v6385_v7 = vld [vmem:[%s8290_s20 + $0x64] ss:$16 sps:$4 sm:$0xff]   ;;  %v6387_v8 = vld [vmem:[%s8290_s20 + $0x60] ss:$16 sps:$4 sm:$0xff]   ;;  %v6405_v13 = vld [vmem:[%s8290_s20 + $0x28] ss:$16 sps:$4 sm:$0xff]   ;;  %342 = vmatprep.subr.bf16.mxu1 %v6403_v12 }
   0xc   :  { %v6388_v11 = vld [vmem:[%s8290_s20 + $0x84] ss:$16 sps:$4 sm:$0xff]   ;;  %v6390_v14 = vld [vmem:[%s8290_s20 + $0x80] ss:$16 sps:$4 sm:$0xff]   ;;  %v6406_v15 = vld [vmem:[%s8290_s20 + $0x4c] ss:$16 sps:$4 sm:$0xff]  }
   0xd   :  { %v6391_v16 = vld [vmem:[%s8290_s20 + $0xa4] ss:$16 sps:$4 sm:$0xff]   ;;  %v6393_v17 = vld [vmem:[%s8290_s20 + $0xa0] ss:$16 sps:$4 sm:$0xff]   ;;  %v6408_v18 = vld [vmem:[%s8290_s20 + $0x48] ss:$16 sps:$4 sm:$0xff]  }
   0xe   :  { %270 = vmatpush1.bf16.msra.mxu0 %v6381_v4  ;;  %343 = vmatpush1.bf16.msra.mxu1 %v6405_v13  ;;  %v6409_v19 = vld [vmem:[%s8290_s20 + $0x6c] ss:$16 sps:$4 sm:$0xff]   ;;  %v6394_v20 = vld [vmem:[%s8290_s20 + $0xc4] ss:$16 sps:$4 sm:$0xff]   ;;  %v6411_v21 = vld [vmem:[%s8290_s20 + $0x68] ss:$16 sps:$4 sm:$0xff]  }
   0xf   :  { %271 = vmatprep.subr.bf16.mxu0 %v6382_v5  ;;  %344 = vmatprep.subr.bf16.mxu1 %v6406_v15  ;;  %v6396_v22 = vld [vmem:[%s8290_s20 + $0xc0] ss:$16 sps:$4 sm:$0xff]   ;;  %v6412_v23 = vld [vmem:[%s8290_s20 + $0x8c] ss:$16 sps:$4 sm:$0xff]   ;;  %v6397_v24 = vld [vmem:[%s8290_s20 + $0xe4] ss:$16 sps:$4 sm:$0xff]  }
  0x10   :  { %v6399_v25 = vld [vmem:[%s8290_s20 + $0xe0] ss:$16 sps:$4 sm:$0xff]   ;;  %v6414_v26 = vld [vmem:[%s8290_s20 + $0x88] ss:$16 sps:$4 sm:$0xff]   ;;  %v6415_v29 = vld [vmem:[%s8290_s20 + $0xac] ss:$16 sps:$4 sm:$0xff]  }
  0x11   :  { %v63_v27 = vld [vmem:[%s8291_s28] sm:$0xff]  ;;  %v64_v28 = vld [vmem:[%s8291_s28 + $0x8] sm:$0xff]  ;;  %v65_v34 = vld [vmem:[%s8291_s28 + $0x10] sm:$0xff]  ;;  %v854_v0 = vshra.s32 %v6884_v56, 4  ;;  %v855_v2 = vshra.s32 %v6890_v59, 4  ;;  %v6914_v5 = vadd.s32 64, %v6860_v47 }
  0x12   :  { %272 = vmatpush1.bf16.msra.mxu0 %v6384_v6  ;;  %345 = vmatpush1.bf16.msra.mxu1 %v6408_v18  ;;  %v71_v30 = vpack.c.bf16 %v64_v28, %v63_v27  ;;  %v6417_v31 = vld [vmem:[%s8290_s20 + $0xa8] ss:$16 sps:$4 sm:$0xff]   ;;  %v6418_v32 = vld [vmem:[%s8290_s20 + $0xcc] ss:$16 sps:$4 sm:$0xff]   ;;  %v67_v39 = vld [vmem:[%s8291_s28 + $0x20] sm:$0xff]  ;;  %v6917_v6 = vadd.s32 72, %v6860_v47 }
  0x13   :  { %273 = vmatprep.subr.bf16.mxu0 %v6385_v7  ;;  %346 = vmatprep.subr.bf16.mxu1 %v6409_v19  ;;  %v6420_v33 = vld [vmem:[%s8290_s20 + $0xc8] ss:$16 sps:$4 sm:$0xff]   ;;  %v6421_v36 = vld [vmem:[%s8290_s20 + $0xec] ss:$16 sps:$4 sm:$0xff]   ;;  %v69_v42 = vld [vmem:[%s8291_s28 + $0x30] sm:$0xff]  ;;  %vm871_vm10 = vcmp.eq.s32.totalorder %v854_v0, %v6869_v51  ;;  %vm872_vm11 = vcmp.eq.s32.totalorder %v855_v2, %v6869_v51  ;;  %v6934_v10 = vadd.s32 80, %v6860_v47 }
  0x14   :  { %v66_v35 = vld [vmem:[%s8291_s28 + $0x18] sm:$0xff]  ;;  %v68_v40 = vld [vmem:[%s8291_s28 + $0x28] sm:$0xff]  ;;  %v4580_v45 = vld [vmem:[%s8292_s1 + $0x20] sm:$0xff]  ;;  %v6625_v3 = vmov 1.0|1.0   ;;  %v857_v9 = vshra.s32 %v6917_v6, 4 }
  0x15   :  { %v72_v37 = vpack.c.bf16 %v66_v35, %v65_v34  ;;  %v6423_v38 = vld [vmem:[%s8290_s20 + $0xe8] ss:$16 sps:$4 sm:$0xff]   ;;  %v73_v41 = vpack.c.bf16 %v68_v40, %v67_v39  ;;  %vm6897_vm4 = vmpackc.low %vm866_vm2, %vm865_vm1  ;;  %v6950_v13 = vadd.s32 96, %v6860_v47  ;;  %v858_v15 = vshra.s32 %v6934_v10, 4 }
  0x16   :  { %274 = vmatpush1.bf16.msra.mxu0 %v6387_v8  ;;  %347 = vmatpush1.bf16.msra.mxu1 %v6411_v21  ;;  %v70_v43 = vld [vmem:[%s8291_s28 + $0x38] sm:$0xff]  ;;  %vm6907_vm6 = vmpackc.low %vm868_vm5, %vm867_vm3  ;;  %v856_v8 = vshra.s32 %v6914_v5, 4  ;;  %vm874_vm14 = vcmp.eq.s32.totalorder %v857_v9, %v6869_v51  ;;  %v6970_v18 = vadd.s32 112, %v6860_v47  ;;  %v6973_v19 = vadd.s32 120, %v6860_v47 }
  0x17   :  { %275 = vmatprep.subr.bf16.mxu0 %v6388_v11  ;;  %348 = vmatprep.subr.bf16.mxu1 %v6412_v23  ;;  %v74_v44 = vpack.c.bf16 %v70_v43, %v69_v42  ;;  %vm6925_vm9 = vmpackc.low %vm870_vm8, %vm869_vm7  ;;  %v6937_v11 = vadd.s32 88, %v6860_v47  ;;  %vm875_vm1 = vcmp.eq.s32.totalorder %v858_v15, %v6869_v51 }
  0x18   :  { %vm6945_vm12 = vmpackc.low %vm872_vm11, %vm871_vm10  ;;  %vm873_vm13 = vcmp.eq.s32.totalorder %v856_v8, %v6869_v51  ;;  %v862_v23 = vshra.s32 %v6970_v18, 4 }
  0x19   :  { %vm6965_vm15 = vmpackc.low %vm874_vm14, %vm873_vm13 }
  0x1a   :  { %276 = vmatpush1.bf16.msra.mxu0 %v6390_v14  ;;  %349 = vmatpush1.bf16.msra.mxu1 %v6414_v26  ;;  %v6953_v14 = vadd.s32 104, %v6860_v47  ;;  %vm879_vm10 = vcmp.eq.s32.totalorder %v862_v23, %v6869_v51  ;;  %v8307_v26 = vmov 0 }
  0x1b   :  { %277 = vmatprep.subr.bf16.mxu0 %v6391_v16  ;;  %350 = vmatprep.subr.bf16.mxu1 %v6415_v29  ;;  %v859_v16 = vshra.s32 %v6937_v11, 4 }
  0x1c   :  { %v861_v21 = vshra.s32 %v6953_v14, 4 }
  0x1d   :  { %vm876_vm2 = vcmp.eq.s32.totalorder %v859_v16, %v6869_v51 }
  0x1e   :  { %278 = vmatpush1.bf16.msra.mxu0 %v6393_v17  ;;  %351 = vmatpush1.bf16.msra.mxu1 %v6417_v31  ;;  %v8301_v17 = vmov 0  ;;  %vm6985_vm3 = vmpackc.low %vm876_vm2, %vm875_vm1  ;;  %vm878_vm7 = vcmp.eq.s32.totalorder %v861_v21, %v6869_v51 }
  0x1f   :  { %279 = vmatprep.subr.bf16.mxu0 %v6394_v20  ;;  %352 = vmatprep.subr.bf16.mxu1 %v6418_v32  ;;  %v8302_v17 = vsel %vm6965_vm15, 4294967295, %v8301_v17  ;;  %v860_v20 = vshra.s32 %v6950_v13, 4 }
  0x21   :  { %vm877_vm5 = vcmp.eq.s32.totalorder %v860_v20, %v6869_v51 }
  0x22   :  { %280 = vmatpush1.bf16.msra.mxu0 %v6396_v22  ;;  %353 = vmatpush1.bf16.msra.mxu1 %v6420_v33  ;;  %v8303_v22 = vmov 0  ;;  %vm6999_vm8 = vmpackc.low %vm878_vm7, %vm877_vm5 }
  0x23   :  { %281 = vmatprep.subr.bf16.mxu0 %v6397_v24  ;;  %354 = vmatprep.subr.bf16.mxu1 %v6421_v36  ;;  %v8304_v22 = vsel %vm6985_vm3, 4294967295, %v8303_v22  ;;  %v863_v24 = vshra.s32 %v6973_v19, 4 }
  0x25   :  { %vm880_vm11 = vcmp.eq.s32.totalorder %v863_v24, %v6869_v51 }
  0x26   :  { %282 = vmatpush1.bf16.msra.mxu0 %v6399_v25  ;;  %355 = vmatpush1.bf16.msra.mxu1 %v6423_v38  ;;  %v8305_v25 = vmov 0  ;;  %vm7011_vm13 = vmpackc.low %vm880_vm11, %vm879_vm10 }
  0x27   :  { %5963 = vmatprep.subr.msk.bf16.mxu1 %vm6897_vm4, %v6625_v3  ;;  %v8306_v25 = vsel %vm6999_vm8, 4294967295, %v8305_v25  ;;  %v8308_v26 = vsel %vm7011_vm13, 4294967295, %v8307_v26 }
  0x29   :  { %300 = vmatmul.mubr.bf16.vlgmr.msra.gmra.mrb[0].mxu0 %v71_v30  ;;  %373 = vmatmul.mubr.bf16.vlgmr.msra.gmra.mrb[0].mxu1 %v71_v30 }
  0x2a   :  { %309 = vmatprep.mubr.bf16.mxu0 %v6624_v1  ;;  %382 = vmatprep.mubr.bf16.mxu1 %v6624_v1 }
  0x2b   :  { %5965 = vmatpush3.bf16.msk.msra.mxu1 %vm6897_vm4, %v6625_v3 }
  0x2c   :  { %5967 = vmatprep.subr.msk.bf16.mxu1 %vm6907_vm6, %v6625_v3 }
  0x2f   :  { %5969 = vmatpush3.bf16.msk.msra.mxu1 %vm6907_vm6, %v6625_v3 }
  0x30   :  { %5971 = vmatprep.subr.msk.bf16.mxu1 %vm6925_vm9, %v6625_v3 }
  0x31   :  { %310 = vmatmul.mubr.bf16.gmra.mrb[4].mxu0 %v72_v37  ;;  %383 = vmatmul.mubr.bf16.gmra.mrb[4].mxu1 %v72_v37 }
  0x32   :  { %319 = vmatprep.mubr.bf16.mxu0 %v6624_v1  ;;  %392 = vmatprep.mubr.bf16.mxu1 %v6624_v1 }
  0x33   :  { %5973 = vmatpush3.bf16.msk.msra.mxu1 %vm6925_vm9, %v6625_v3 }
  0x34   :  { %5975 = vmatprep.subr.msk.bf16.mxu1 %vm6945_vm12, %v6625_v3 }
  0x37   :  { %5977 = vmatpush3.bf16.msk.msra.mxu1 %vm6945_vm12, %v6625_v3 }
  0x38   :  { %5979 = vmatprep.subr.msk.bf16.mxu1 %vm6965_vm15, %v6625_v3 }
  0x39   :  { %320 = vmatmul.mubr.bf16.gmra.mrb[8].mxu0 %v73_v41  ;;  %393 = vmatmul.mubr.bf16.gmra.mrb[8].mxu1 %v73_v41 }
  0x3a   :  { %329 = vmatprep.mubr.bf16.mxu0 %v6624_v1  ;;  %402 = vmatprep.mubr.bf16.mxu1 %v6624_v1 }
  0x3b   :  { %5981 = vmatpush3.bf16.msk.msra.mxu1 %vm6965_vm15, %v6625_v3 }
  0x3c   :  { %5983 = vmatprep.subr.msk.bf16.mxu1 %vm6985_vm3, %v6625_v3 }
  0x3f   :  { %5985 = vmatpush3.bf16.msk.msra.mxu1 %vm6985_vm3, %v6625_v3 }
  0x40   :  { %5987 = vmatprep.subr.msk.bf16.mxu1 %vm6999_vm8, %v6625_v3 }
  0x41   :  { %330 = vmatmul.mubr.bf16.gmra.mrb[12].mxu0 %v74_v44  ;;  %403 = vmatmul.mubr.bf16.gmra.mrb[12].mxu1 %v74_v44 }
  0x42   :  { %5329 = vmatprep.mubr.msk.f32.mxu0 %vm422_vm0, %v4580_v45 }
  0x43   :  { %5989 = vmatpush3.bf16.msk.msra.mxu1 %vm6999_vm8, %v6625_v3 }
  0x44   :  { %5991 = vmatprep.subr.msk.bf16.mxu1 %vm7011_vm13, %v6625_v3 }
  0x47   :  { %5993 = vmatpush3.bf16.msk.msra.mxu1 %vm7011_vm13, %v6625_v3 }
  0x48   :  { %5995 = vmatprep.subr.msk.bf16.mxu1 %vm6897_vm4, %v6625_v3 }
  0xfc   :  { %v301_v27 = vpop.f32.mrb[0].mxu0  ;;  %v374_v38 = vpop.f32.mrb[0].mxu1 }
  0xfd   :  { %v303_v28 = vpop.f32.mrb[1].mxu0  ;;  %v376_v40 = vpop.f32.mrb[1].mxu1 }
  0xfe   :  { %v305_v29 = vpop.f32.mrb[2].mxu0  ;;  %v378_v41 = vpop.f32.mrb[2].mxu1 }
  0xff   :  { %v5914_v30 = vpack.c.bf16 %v305_v29, %v301_v27  ;;  %v307_v31 = vpop.f32.mrb[3].mxu0  ;;  %v5930_v42 = vpack.c.bf16 %v378_v41, %v374_v38  ;;  %v380_v43 = vpop.f32.mrb[3].mxu1  ;;  %v413_v38 = vld [vmem:[%s8292_s1] sm:$0xff] }
 0x100   :  { %v5898_v32 = vpack.c.bf16 %v307_v31, %v303_v28  ;;  %v7027_v44 = vpack.c.bf16 %v380_v43, %v376_v40 }
 0x102   :  { %5899 = vmatprep.subr.bf16.mxu0 %v5898_v32 }
 0x103   :  { %5901 = vmatpush3.bf16.msra.mxu0 %v5898_v32  ;;  %v4581_v32 = vld [vmem:[%s8292_s1 + $0x28] sm:$0xff] }
 0x104   :  { %v311_v33 = vpop.f32.mrb[4].mxu0  ;;  %v384_v58 = vpop.f32.mrb[4].mxu1 }
 0x105   :  { %v313_v34 = vpop.f32.mrb[5].mxu0  ;;  %v386_v61 = vpop.f32.mrb[5].mxu1 }
 0x106   :  { %v315_v35 = vpop.f32.mrb[6].mxu0  ;;  %v388_v62 = vpop.f32.mrb[6].mxu1 }
 0x107   :  { %v5918_v36 = vpack.c.bf16 %v315_v35, %v311_v33  ;;  %v317_v37 = vpop.f32.mrb[7].mxu0  ;;  %v5934_v0 = vpack.c.bf16 %v388_v62, %v384_v58  ;;  %v390_v2 = vpop.f32.mrb[7].mxu1  ;;  %v4583_v35 = vld [vmem:[%s8292_s1 + $0x38] sm:$0xff]  ;;  %v4600_v58 = vld [vmem:[%s8292_s1 + $0x60] sm:$0xff] }
 0x108   :  { %v5902_v39 = vpack.c.bf16 %v317_v37, %v313_v34  ;;  %v7029_v8 = vpack.c.bf16 %v390_v2, %v386_v61  ;;  %v4582_v34 = vld [vmem:[%s8292_s1 + $0x30] sm:$0xff]  ;;  %v4603_v61 = vld [vmem:[%s8292_s1 + $0x78] sm:$0xff] }
 0x10a   :  { %5903 = vmatprep.subr.bf16.mxu0 %v5902_v39 }
 0x10b   :  { %5905 = vmatpush3.bf16.msra.mxu0 %v5902_v39 }
 0x10c   :  { %v321_v45 = vpop.f32.mrb[8].mxu0  ;;  %v394_v23 = vpop.f32.mrb[8].mxu1 }
 0x10d   :  { %v323_v46 = vpop.f32.mrb[9].mxu0  ;;  %v396_v27 = vpop.f32.mrb[9].mxu1 }
 0x10e   :  { %v325_v50 = vpop.f32.mrb[10].mxu0  ;;  %v398_v28 = vpop.f32.mrb[10].mxu1 }
 0x10f   :  { %v5922_v51 = vpack.c.bf16 %v325_v50, %v321_v45  ;;  %v327_v57 = vpop.f32.mrb[11].mxu0  ;;  %v5938_v29 = vpack.c.bf16 %v398_v28, %v394_v23  ;;  %v400_v31 = vpop.f32.mrb[11].mxu1  ;;  %v414_v45 = vld [vmem:[%s8292_s1 + $0x8] sm:$0xff]  ;;  %v4592_v50 = vld [vmem:[%s8292_s1 + $0x40] sm:$0xff] }
 0x110   :  { %v5906_v60 = vpack.c.bf16 %v327_v57, %v323_v46  ;;  %v5954_v33 = vpack.c.bf16 %v400_v31, %v396_v27  ;;  %v415_v46 = vld [vmem:[%s8292_s1 + $0x10] sm:$0xff]  ;;  %v4595_v57 = vld [vmem:[%s8292_s1 + $0x58] sm:$0xff] }
 0x112   :  { %5907 = vmatprep.subr.bf16.mxu0 %v5906_v60 }
 0x113   :  { %5909 = vmatpush3.bf16.msra.mxu0 %v5906_v60  ;;  %v4602_v60 = vld [vmem:[%s8292_s1 + $0x70] sm:$0xff] }
 0x114   :  { %v331_v9 = vpop.f32.mrb[12].mxu0  ;;  %v404_v37 = vpop.f32.mrb[12].mxu1 }
 0x115   :  { %v333_v15 = vpop.f32.mrb[13].mxu0  ;;  %v406_v39 = vpop.f32.mrb[13].mxu1 }
 0x116   :  { %v335_v16 = vpop.f32.mrb[14].mxu0  ;;  %v408_v40 = vpop.f32.mrb[14].mxu1 }
 0x117   :  { %v5926_v20 = vpack.c.bf16 %v335_v16, %v331_v9  ;;  %v337_v21 = vpop.f32.mrb[15].mxu0  ;;  %v5942_v41 = vpack.c.bf16 %v408_v40, %v404_v37  ;;  %v410_v43 = vpop.f32.mrb[15].mxu1 }
 0x118   :  { %v5910_v24 = vpack.c.bf16 %v337_v21, %v333_v15 }
 0x11a   :  { %5911 = vmatprep.subr.bf16.mxu0 %v5910_v24 }
 0x11b   :  { %5913 = vmatpush3.bf16.msra.mxu0 %v5910_v24 }
 0x11c   :  { %5915 = vmatprep.subr.bf16.mxu0 %v5914_v30 }
 0x11e   :  { %5330 = vmatmul.mubr.msk.f32.vlgmr.msra.gmra.mrb[16].mxu0 %vm422_vm0, %v4581_v32 }
 0x11f   :  { %5917 = vmatpush3.bf16.msra.mxu0 %v5914_v30  ;;  %5332 = vmatprep.mubr.msk.f32.mxu0 %vm422_vm0, %v4582_v34  ;;  %v5958_v30 = vpack.c.bf16 %v410_v43, %v406_v39 }
 0x120   :  { %5919 = vmatprep.subr.bf16.mxu0 %v5918_v36 }
 0x122   :  { %5333 = vmatmul.mubr.msk.f32.gmra.mrb[18].mxu0 %vm422_vm0, %v4583_v35 }
 0x123   :  { %5921 = vmatpush3.bf16.msra.mxu0 %v5918_v36  ;;  %5351 = vmatprep.mubr.msk.f32.mxu0 %vm422_vm0, %v413_v38  ;;  %v416_v36 = vld [vmem:[%s8292_s1 + $0x18] sm:$0xff] }
 0x124   :  { %5923 = vmatprep.subr.bf16.mxu0 %v5922_v51 }
 0x127   :  { %5925 = vmatpush3.bf16.msra.mxu0 %v5922_v51  ;;  %v4594_v51 = vld [vmem:[%s8292_s1 + $0x50] sm:$0xff] }
 0x128   :  { %5927 = vmatprep.subr.bf16.mxu0 %v5926_v20 }
 0x12b   :  { %5929 = vmatpush3.bf16.msra.mxu0 %v5926_v20 }
 0x12c   :  { %5931 = vmatprep.subr.bf16.mxu0 %v5930_v42 }
 0x12e   :  { %5352 = vmatmul.mubr.msk.f32.vlgmr.msra.gmra.mrb[16].mxu0 %vm422_vm0, %v414_v45  ;;  %v6426_v45 = vld [vmem:[%s8309_s0 + $0x4] ss:$16 sps:$4 sm:$0xff]  }
 0x12f   :  { %5933 = vmatpush3.bf16.msra.mxu0 %v5930_v42  ;;  %5354 = vmatprep.mubr.msk.f32.mxu0 %vm422_vm0, %v415_v46  ;;  %v4593_v42 = vld [vmem:[%s8292_s1 + $0x48] sm:$0xff]  ;;  %v6424_v46 = vld [vmem:[%s8309_s0] ss:$16 sps:$4 sm:$0xff]  }
 0x130   :  { %5935 = vmatprep.subr.bf16.mxu0 %v5934_v0 }
 0x132   :  { %5355 = vmatmul.mubr.msk.f32.gmra.mrb[18].mxu0 %vm422_vm0, %v416_v36  ;;  %v6427_v36 = vld [vmem:[%s8309_s0 + $0x8] ss:$16 sps:$4 sm:$0xff]  }
 0x133   :  { %5937 = vmatpush3.bf16.msra.mxu0 %v5934_v0  ;;  %5373 = vmatprep.mubr.msk.f32.mxu0 %vm422_vm0, %v4592_v50  ;;  %v6429_v50 = vld [vmem:[%s8309_s0 + $0xc] ss:$16 sps:$4 sm:$0xff]  }
 0x134   :  { %5939 = vmatprep.subr.bf16.mxu0 %v5938_v29 }
 0x137   :  { %5941 = vmatpush3.bf16.msra.mxu0 %v5938_v29 }
 0x138   :  { %5943 = vmatprep.subr.bf16.mxu0 %v5942_v41 }
 0x13b   :  { %5945 = vmatpush3.bf16.msra.mxu0 %v5942_v41 }
 0x13c   :  { %5947 = vmatprep.subr.bf16.mxu0 %v7027_v44 }
 0x13e   :  { %5374 = vmatmul.mubr.msk.f32.vlgmr.msra.gmra.mrb[16].mxu0 %vm422_vm0, %v4593_v42  ;;  %v6432_v42 = vld [vmem:[%s8309_s0 + $0x24] ss:$16 sps:$4 sm:$0xff]  }
 0x13f   :  { %5949 = vmatpush3.bf16.msra.mxu0 %v7027_v44  ;;  %5376 = vmatprep.mubr.msk.f32.mxu0 %vm422_vm0, %v4594_v51  ;;  %v4601_v44 = vld [vmem:[%s8292_s1 + $0x68] sm:$0xff] }
 0x140   :  { %5951 = vmatprep.subr.bf16.mxu0 %v7029_v8  ;;  %v6435_v51 = vld [vmem:[%s8309_s0 + $0x2c] ss:$16 sps:$4 sm:$0xff]  }
 0x142   :  { %5377 = vmatmul.mubr.msk.f32.gmra.mrb[18].mxu0 %vm422_vm0, %v4595_v57  ;;  %v6430_v57 = vld [vmem:[%s8309_s0 + $0x20] ss:$16 sps:$4 sm:$0xff]  }
 0x143   :  { %5953 = vmatpush3.bf16.msra.mxu0 %v7029_v8  ;;  %5395 = vmatprep.mubr.msk.f32.mxu0 %vm422_vm0, %v4600_v58  ;;  %v6433_v58 = vld [vmem:[%s8309_s0 + $0x28] ss:$16 sps:$4 sm:$0xff]  }
 0x144   :  { %5955 = vmatprep.subr.bf16.mxu0 %v5954_v33 }
 0x147   :  { %5957 = vmatpush3.bf16.msra.mxu0 %v5954_v33 }
 0x148   :  { %5959 = vmatprep.subr.bf16.mxu0 %v5958_v30 }
 0x14b   :  { %5961 = vmatpush3.bf16.msra.mxu0 %v5958_v30 }
 0x14c   :  { %1389 = vmatprep.subr.bf16.mxu0 %v6429_v50 }
 0x14e   :  { %5396 = vmatmul.mubr.msk.f32.vlgmr.msra.gmra.mrb[16].mxu0 %vm422_vm0, %v4601_v44  ;;  %v6438_v44 = vld [vmem:[%s8309_s0 + $0x44] ss:$16 sps:$4 sm:$0xff]  }
 0x14f   :  { %5398 = vmatprep.mubr.msk.f32.mxu0 %vm422_vm0, %v4602_v60  ;;  %1390 = vmatpush1.bf16.msra.mxu0 %v6427_v36  ;;  %v6441_v60 = vld [vmem:[%s8309_s0 + $0x4c] ss:$16 sps:$4 sm:$0xff]  }
 0x150   :  { %1391 = vmatprep.subr.bf16.mxu0 %v6435_v51 }
 0x152   :  { %5399 = vmatmul.mubr.msk.f32.gmra.mrb[18].mxu0 %vm422_vm0, %v4603_v61  ;;  %v6436_v61 = vld [vmem:[%s8309_s0 + $0x40] ss:$16 sps:$4 sm:$0xff]   ;;  %vm8277_vm0 = vcmask 261120  }
 0x153   :  { %1421 = vmatprep.mubr.bf16.mxu0 %v6624_v1  ;;  %1392 = vmatpush1.bf16.msra.mxu0 %v6433_v58 }
 0x154   :  { %1393 = vmatprep.subr.bf16.mxu0 %v6441_v60 }
 0x221   :  { %v7096_v62 = vpop.f32.mrb[16].mxu0 }
 0x222   :  { %v7098_v0 = vpop.f32.mrb[17].mxu0 }
 0x223   :  { %5433 = vmatprep.mubr.f32.mxu1 %v7098_v0 }
 0x224   :  { %5434 = vmatmul.mubr.f32.vlgmr.msra.gmra.mrb[16].mxu1 %v7096_v62 }
 0x225   :  { %v7102_v2 = vpop.f32.mrb[18].mxu0  ;;  %5997 = vmatpush3.bf16.msk.msra.mxu1 %vm6897_vm4, %v6625_v3 }
 0x226   :  { %v7107_v8 = vpop.f32.mrb[19].mxu0  ;;  %5999 = vmatprep.subr.msk.bf16.mxu1 %vm6907_vm6, %v6625_v3 }
 0x227   :  { %5436 = vmatprep.mubr.f32.mxu1 %v7107_v8 }
 0x228   :  { %5437 = vmatmul.mubr.f32.gmra.mrb[18].mxu1 %v7102_v2 }
 0x229   :  { %6001 = vmatpush3.bf16.msk.msra.mxu1 %vm6907_vm6, %v6625_v3 }
 0x22a   :  { %6003 = vmatprep.subr.msk.bf16.mxu1 %vm6925_vm9, %v6625_v3 }
 0x22d   :  { %6005 = vmatpush3.bf16.msk.msra.mxu1 %vm6925_vm9, %v6625_v3 }
 0x22e   :  { %6007 = vmatprep.subr.msk.bf16.mxu1 %vm6945_vm12, %v6625_v3 }
 0x231   :  { %6009 = vmatpush3.bf16.msk.msra.mxu1 %vm6945_vm12, %v6625_v3 }
 0x232   :  { %6011 = vmatprep.subr.msk.bf16.mxu1 %vm6965_vm15, %v6625_v3 }
 0x235   :  { %6013 = vmatpush3.bf16.msk.msra.mxu1 %vm6965_vm15, %v6625_v3 }
 0x236   :  { %6015 = vmatprep.subr.msk.bf16.mxu1 %vm6985_vm3, %v6625_v3 }
 0x239   :  { %6017 = vmatpush3.bf16.msk.msra.mxu1 %vm6985_vm3, %v6625_v3 }
 0x23a   :  { %6019 = vmatprep.subr.msk.bf16.mxu1 %vm6999_vm8, %v6625_v3 }
 0x23d   :  { %6021 = vmatpush3.bf16.msk.msra.mxu1 %vm6999_vm8, %v6625_v3 }
 0x23e   :  { %6023 = vmatprep.subr.msk.bf16.mxu1 %vm7011_vm13, %v6625_v3 }
 0x241   :  { %6025 = vmatpush3.bf16.msk.msra.mxu1 %vm7011_vm13, %v6625_v3 }
 0x242   :  { %1336 = vmatprep.subr.bf16.mxu1 %v6426_v45 }
 0x2f7   :  { %v5435_v9 = vpop.f32.mrb[16].mxu1 }
 0x2f8   :  { %v979_v15 = vpop.f32.mrb[17].mxu1 }
 0x2f9   :  { %v998_v16 = vadd.f32 %v5435_v9, %v979_v15  ;;  %v6439_v9 = vld [vmem:[%s8309_s0 + $0x48] ss:$16 sps:$4 sm:$0xff]   ;;  %v6444_v15 = vld [vmem:[%s8309_s0 + $0x64] ss:$16 sps:$4 sm:$0xff]  }
 0x2fa   :  { %1394 = vmatpush1.bf16.msra.mxu0 %v6439_v9 }
 0x2fb   :  { %v5438_v20 = vpop.f32.mrb[18].mxu1 }
 0x2fc   :  { %v989_v21 = vpop.f32.mrb[19].mxu1 }
 0x2fd   :  { %v999_v23 = vadd.f32 %v998_v16, %v989_v21  ;;  %v6447_v16 = vld [vmem:[%s8309_s0 + $0x6c] ss:$16 sps:$4 sm:$0xff]   ;;  %v6445_v21 = vld [vmem:[%s8309_s0 + $0x68] ss:$16 sps:$4 sm:$0xff]  }
 0x2fe   :  { %1395 = vmatprep.subr.bf16.mxu0 %v6447_v16 }
 0x2ff   :  { %v1000_v24 = vadd.f32 %v5438_v20, %v999_v23  ;;  %v6442_v20 = vld [vmem:[%s8309_s0 + $0x60] ss:$16 sps:$4 sm:$0xff]   ;;  %v6450_v23 = vld [vmem:[%s8309_s0 + $0x84] ss:$16 sps:$4 sm:$0xff]   ;;  %1396 = vmatpush1.bf16.msra.mxu0 %v6445_v21 }
 0x300   :  { %v1111_v21 = vld [vmem:[%s8257_s3] sm:$0x1] }
 0x301   :  { %v1001_v27 = vrot.slane %v1000_v24, 4 }
 0x303   :  { %v1002_v28 = vadd.f32 %v1001_v27, %v1000_v24  ;;  %v6453_v24 = vld [vmem:[%s8309_s0 + $0x8c] ss:$16 sps:$4 sm:$0xff]   ;;  %v6448_v27 = vld [vmem:[%s8309_s0 + $0x80] ss:$16 sps:$4 sm:$0xff]  }
 0x304   :  { %1397 = vmatprep.subr.bf16.mxu0 %v6453_v24 }
 0x305   :  { %v1003_v29 = vrot.slane %v1002_v28, 2 }
 0x307   :  { %v1004_v31 = vadd.f32 %v1003_v29, %v1002_v28  ;;  %v6451_v28 = vld [vmem:[%s8309_s0 + $0x88] ss:$16 sps:$4 sm:$0xff]   ;;  %v6456_v29 = vld [vmem:[%s8309_s0 + $0xa4] ss:$16 sps:$4 sm:$0xff]  }
 0x308   :  { %1398 = vmatpush1.bf16.msra.mxu0 %v6451_v28  ;;  %v1115_v28 = vld [vmem:[%s8258_s4] sm:$0x1] }
 0x309   :  { %v1005_v32 = vrot.slane %v1004_v31, 1 }
 0x30b   :  { %v1006_v33 = vadd.f32 %v1005_v32, %v1004_v31  ;;  %v6459_v31 = vld [vmem:[%s8309_s0 + $0xac] ss:$16 sps:$4 sm:$0xff]   ;;  %v6454_v32 = vld [vmem:[%s8309_s0 + $0xa0] ss:$16 sps:$4 sm:$0xff]  }
 0x30c   :  { %1399 = vmatprep.subr.bf16.mxu0 %v6459_v31 }
 0x30d   :  { %v7153_v34 = vmul.f32 0.001953125, %v1006_v33  ;;  %v6457_v33 = vld [vmem:[%s8309_s0 + $0xa8] ss:$16 sps:$4 sm:$0xff]  }
 0x30e   :  { %1400 = vmatpush1.bf16.msra.mxu0 %v6457_v33 }
 0x30f   :  { %v1008_v35 = vsub.f32 %v7098_v0, %v7153_v34  ;;  %v1009_v37 = vsub.f32 %v7096_v62, %v7153_v34  ;;  %v1010_v38 = vsub.f32 %v7107_v8, %v7153_v34  ;;  %v1011_v41 = vsub.f32 %v7102_v2, %v7153_v34 }
 0x311   :  { %v1012_v39 = vmul.f32 %v1008_v35, %v1008_v35  ;;  %v1013_v40 = vmul.f32 %v1009_v37, %v1009_v37  ;;  %v1014_v43 = vmul.f32 %v1010_v38, %v1010_v38  ;;  %v1015_v30 = vmul.f32 %v1011_v41, %v1011_v41  ;;  %v6462_v35 = vld [vmem:[%s8309_s0 + $0xc4] ss:$16 sps:$4 sm:$0xff]   ;;  %v6460_v37 = vld [vmem:[%s8309_s0 + $0xc0] ss:$16 sps:$4 sm:$0xff]   ;;  %v6465_v38 = vld [vmem:[%s8309_s0 + $0xcc] ss:$16 sps:$4 sm:$0xff]  }
 0x312   :  { %1401 = vmatprep.subr.bf16.mxu0 %v6465_v38  ;;  %v6471_v41 = vld [vmem:[%s8309_s0 + $0xec] ss:$16 sps:$4 sm:$0xff]  }
 0x313   :  { %5471 = vmatprep.mubr.f32.mxu1 %v1012_v39  ;;  %v6468_v39 = vld [vmem:[%s8309_s0 + $0xe4] ss:$16 sps:$4 sm:$0xff]  }
 0x314   :  { %5472 = vmatmul.mubr.f32.vlgmr.msra.gmra.mrb[20].mxu1 %v1013_v40  ;;  %v6463_v40 = vld [vmem:[%s8309_s0 + $0xc8] ss:$16 sps:$4 sm:$0xff]  }
 0x315   :  { %5474 = vmatprep.mubr.f32.mxu1 %v1014_v43  ;;  %1337 = vmatpush1.bf16.msra.mxu1 %v6424_v46  ;;  %v6466_v43 = vld [vmem:[%s8309_s0 + $0xe0] ss:$16 sps:$4 sm:$0xff]  }
 0x316   :  { %1338 = vmatprep.subr.bf16.mxu1 %v6432_v42  ;;  %1402 = vmatpush1.bf16.msra.mxu0 %v6463_v40 }
 0x317   :  { %1403 = vmatprep.subr.bf16.mxu0 %v6471_v41 }
 0x318   :  { %5475 = vmatmul.mubr.f32.gmra.mrb[22].mxu1 %v1015_v30  ;;  %v6469_v30 = vld [vmem:[%s8309_s0 + $0xe8] ss:$16 sps:$4 sm:$0xff]  }
 0x319   :  { %1368 = vmatprep.mubr.bf16.mxu1 %v6624_v1  ;;  %1339 = vmatpush1.bf16.msra.mxu1 %v6430_v57 }
 0x31a   :  { %1340 = vmatprep.subr.bf16.mxu1 %v6438_v44  ;;  %1404 = vmatpush1.bf16.msra.mxu0 %v6469_v30 }
 0x31d   :  { %1341 = vmatpush1.bf16.msra.mxu1 %v6436_v61 }
 0x31e   :  { %1342 = vmatprep.subr.bf16.mxu1 %v6444_v15 }
 0x321   :  { %1343 = vmatpush1.bf16.msra.mxu1 %v6442_v20 }
 0x322   :  { %1344 = vmatprep.subr.bf16.mxu1 %v6450_v23  ;;  %v7264_v23 = vsub.s32 0, %v6860_v47 }
 0x325   :  { %1345 = vmatpush1.bf16.msra.mxu1 %v6448_v27 }
 0x326   :  { %1346 = vmatprep.subr.bf16.mxu1 %v6456_v29 }
 0x329   :  { %1347 = vmatpush1.bf16.msra.mxu1 %v6454_v32 }
 0x32a   :  { %1348 = vmatprep.subr.bf16.mxu1 %v6462_v35 }
 0x32d   :  { %1349 = vmatpush1.bf16.msra.mxu1 %v6460_v37 }
 0x32e   :  { %1350 = vmatprep.subr.bf16.mxu1 %v6468_v39 }
 0x331   :  { %1351 = vmatpush1.bf16.msra.mxu1 %v6466_v43 }
 0x3e7   :  { %v5473_v45 = vpop.f32.mrb[20].mxu1 }
 0x3e8   :  { %v1082_v46 = vpop.f32.mrb[21].mxu1 }
 0x3e9   :  { %v1101_v36 = vadd.f32 %v5473_v45, %v1082_v46 }
 0x3eb   :  { %v5476_v50 = vpop.f32.mrb[22].mxu1 }
 0x3ec   :  { %v1092_v42 = vpop.f32.mrb[23].mxu1 }
 0x3ed   :  { %v1102_v51 = vadd.f32 %v1101_v36, %v1092_v42 }
 0x3ef   :  { %v1103_v57 = vadd.f32 %v5476_v50, %v1102_v51  ;;  %v1784_v51 = vshra.s32 %v6872_v52, 3 }
 0x3f1   :  { %v1104_v58 = vrot.slane %v1103_v57, 4 }
 0x3f3   :  { %v1105_v44 = vadd.f32 %v1104_v58, %v1103_v57  ;;  %v1785_v57 = vshra.s32 %v6875_v53, 3  ;;  %v1786_v58 = vshra.s32 %v6878_v54, 3  ;;  %v1790_v53 = vshra.s32 %v6914_v5, 3 }
 0x3f4   :  { %v1791_v54 = vshra.s32 %v6917_v6, 3  ;;  %v1794_v6 = vshra.s32 %v6950_v13, 3  ;;  %v1797_v13 = vshra.s32 %v6973_v19, 3 }
 0x3f5   :  { %v1106_v60 = vrot.slane %v1105_v44, 2 }
 0x3f7   :  { %v1107_v61 = vadd.f32 %v1106_v60, %v1105_v44  ;;  %v1787_v44 = vshra.s32 %v6881_v55, 3 }
 0x3f9   :  { %v1108_v9 = vrot.slane %v1107_v61, 1 }
 0x3fb   :  { %v1109_v15 = vadd.f32 %v1108_v9, %v1107_v61  ;;  %v1796_v61 = vshra.s32 %v6970_v18, 3 }
 0x3fd   :  { %v1110_v16 = vmul.f32 0.001953125, %v1109_v15 }
 0x3ff   :  { %v1112_v20 = vadd.f32 1e-05, %v1110_v16 }
 0x401   :  { %6600 = vrsqrt.f32 %v1112_v20 }
 0x40b   :  { %v6601_v24 = vpop.eup %6600 }
 0x40c   :  { %v1114_v27 = vmul.f32 %v6601_v24, %v1111_v21 }
 0x40e   :  { %v1116_v29 = vmul.f32 %v1114_v27, %v7153_v34  ;;  %v1122_v31 = vrot.slane %v1114_v27, %v7264_v23 }
 0x410   :  { %v1117_v32 = vsub.f32 %v1115_v28, %v1116_v29  ;;  %v1124_v33 = vmul.f32 %v1122_v31, %v7098_v0  ;;  %v1125_v35 = vmul.f32 %v7096_v62, %v1122_v31  ;;  %v1126_v37 = vmul.f32 %v1122_v31, %v7107_v8  ;;  %v4688_v62 = vld [vmem:[%s8259_s6 + $0x10] sm:$0xff] }
 0x411   :  { %v1127_v38 = vmul.f32 %v7102_v2, %v1122_v31  ;;  %v1782_v0 = vshra.s32 %v6860_v47, 3  ;;  %v1783_v2 = vshra.s32 %v6865_v49, 3  ;;  %v1798_v8 = vshra.s32 %v6862_v48, 3 }
 0x412   :  { %v1132_v39 = vrot.slane %v1117_v32, %v7264_v23  ;;  %v1788_v48 = vshra.s32 %v6884_v56, 3  ;;  %v1789_v49 = vshra.s32 %v6890_v59, 3  ;;  %v1792_v56 = vshra.s32 %v6934_v10, 3 }
 0x413   :  { %vm1799_vm14 = vcmp.eq.s32.totalorder %v1782_v0, %v1798_v8  ;;  %vm1800_vm1 = vcmp.eq.s32.totalorder %v1783_v2, %v1798_v8  ;;  %vm1801_vm2 = vcmp.eq.s32.totalorder %v1784_v51, %v1798_v8  ;;  %vm1802_vm7 = vcmp.eq.s32.totalorder %v1785_v57, %v1798_v8  ;;  %v4695_v0 = vld [vmem:[%s8259_s6 + $0x28] sm:$0xff]  ;;  %v4698_v2 = vld [vmem:[%s8259_s6 + $0x30] sm:$0xff] }
 0x414   :  { %v1134_v40 = vadd.f32 %v1132_v39, %v1124_v33  ;;  %v1135_v41 = vadd.f32 %v1132_v39, %v1125_v35  ;;  %v1136_v43 = vadd.f32 %v1132_v39, %v1126_v37  ;;  %v1137_v30 = vadd.f32 %v1132_v39, %v1127_v38  ;;  %vm7289_vm5 = vmpackc.low %vm1800_vm1, %vm1799_vm14 }
 0x415   :  { %6059 = vmatprep.subr.msk.bf16.mxu0 %vm7289_vm5, %v6625_v3  ;;  %vm7296_vm10 = vmpackc.low %vm1802_vm7, %vm1801_vm2  ;;  %vm1803_vm11 = vcmp.eq.s32.totalorder %v1786_v58, %v1798_v8  ;;  %vm1805_vm1 = vcmp.eq.s32.totalorder %v1788_v48, %v1798_v8  ;;  %vm1806_vm2 = vcmp.eq.s32.totalorder %v1789_v49, %v1798_v8  ;;  %v1793_v59 = vshra.s32 %v6937_v11, 3 }
 0x416   :  { %v1138_v45 = vmax.f32 %v1134_v40, 0.0  ;;  %v1139_v46 = vmax.f32 %v1135_v41, 0.0  ;;  %v1140_v34 = vmax.f32 %v1136_v43, 0.0  ;;  %v1141_v36 = vmax.f32 %v1137_v30, 0.0  ;;  %vm7320_vm7 = vmpackc.low %vm1806_vm2, %vm1805_vm1 }
 0x417   :  { %vm1809_vm1 = vcmp.eq.s32.totalorder %v1792_v56, %v1798_v8  ;;  %vm1810_vm2 = vcmp.eq.s32.totalorder %v1793_v59, %v1798_v8  ;;  %v1795_v10 = vshra.s32 %v6953_v14, 3 }
 0x418   :  { %v1142_v50 = vpack.c.bf16 %v1139_v46, %v1138_v45  ;;  %v1143_v42 = vpack.c.bf16 %v1141_v36, %v1140_v34  ;;  %vm7344_vm8 = vmpackc.low %vm1810_vm2, %vm1809_vm1  ;;  %vm1813_vm1 = vcmp.eq.s32.totalorder %v1796_v61, %v1798_v8  ;;  %vm1814_vm2 = vcmp.eq.s32.totalorder %v1797_v13, %v1798_v8  ;;  %v4689_v36 = vld [vmem:[%s8259_s6 + $0x18] sm:$0xff] }
 0x419   :  { %vm7366_vm15 = vmpackc.low %vm1814_vm2, %vm1813_vm1 }
 0x41a   :  { %1369 = vmatmul.mubr.bf16.vlgmr.msra.gmra.mrb[24].mxu1 %v1142_v50  ;;  %1422 = vmatmul.mubr.bf16.vlgmr.msra.gmra.mrb[20].mxu0 %v1142_v50  ;;  %v1442_v50 = vld [vmem:[%s8259_s6] sm:$0xff] }
 0x41b   :  { %1378 = vmatprep.mubr.bf16.mxu1 %v6624_v1  ;;  %1431 = vmatprep.mubr.bf16.mxu0 %v6624_v1 }
 0x41c   :  { %6061 = vmatpush3.bf16.msk.msra.mxu0 %vm7289_vm5, %v6625_v3 }
 0x41d   :  { %6063 = vmatprep.subr.msk.bf16.mxu0 %vm7296_vm10, %v6625_v3 }
 0x420   :  { %6065 = vmatpush3.bf16.msk.msra.mxu0 %vm7296_vm10, %v6625_v3 }
 0x422   :  { %1379 = vmatmul.mubr.bf16.gmra.mrb[28].mxu1 %v1143_v42  ;;  %1432 = vmatmul.mubr.bf16.gmra.mrb[24].mxu0 %v1143_v42  ;;  %v1443_v42 = vld [vmem:[%s8259_s6 + $0x8] sm:$0xff] }
 0x423   :  { %5485 = vmatprep.mubr.msk.f32.mxu1 %vm8277_vm0, %v4688_v62  ;;  %vm1804_vm0 = vcmp.eq.s32.totalorder %v1787_v44, %v1798_v8  ;;  %v4694_v62 = vld [vmem:[%s8259_s6 + $0x20] sm:$0xff] }
 0x424   :  { %vm7308_vm14 = vmpackc.low %vm1804_vm0, %vm1803_vm11  ;;  %vm1807_vm0 = vcmp.eq.s32.totalorder %v1790_v53, %v1798_v8  ;;  %vm1808_vm11 = vcmp.eq.s32.totalorder %v1791_v54, %v1798_v8 }
 0x425   :  { %6067 = vmatprep.subr.msk.bf16.mxu0 %vm7308_vm14, %v6625_v3  ;;  %vm7332_vm13 = vmpackc.low %vm1808_vm11, %vm1807_vm0  ;;  %vm1811_vm0 = vcmp.eq.s32.totalorder %v1794_v6, %v1798_v8  ;;  %vm1812_vm11 = vcmp.eq.s32.totalorder %v1795_v10, %v1798_v8  ;;  %v4699_v8 = vld [vmem:[%s8259_s6 + $0x38] sm:$0xff] }
 0x426   :  { %6069 = vmatpush3.bf16.msk.msra.mxu0 %vm7308_vm14, %v6625_v3  ;;  %vm7356_vm3 = vmpackc.low %vm1812_vm11, %vm1811_vm0  ;;  %vm8326_vm0 = vcmask 261120  }
 0x427   :  { %6071 = vmatprep.subr.msk.bf16.mxu0 %vm7320_vm7, %v6625_v3  ;;  %vm8327_vm11 = vmmov %vm8326_vm0 }
 0x428   :  { %vm8328_vm1 = vmmov %vm8326_vm0 }
 0x429   :  { %vm8329_vm2 = vmmov %vm8326_vm0 }
 0x42a   :  { %6073 = vmatpush3.bf16.msk.msra.mxu0 %vm7320_vm7, %v6625_v3 }
 0x42b   :  { %6075 = vmatprep.subr.msk.bf16.mxu0 %vm7332_vm13, %v6625_v3 }
 0x42e   :  { %6077 = vmatpush3.bf16.msk.msra.mxu0 %vm7332_vm13, %v6625_v3 }
 0x42f   :  { %6079 = vmatprep.subr.msk.bf16.mxu0 %vm7344_vm8, %v6625_v3 }
 0x432   :  { %6081 = vmatpush3.bf16.msk.msra.mxu0 %vm7344_vm8, %v6625_v3 }
 0x433   :  { %6083 = vmatprep.subr.msk.bf16.mxu0 %vm7356_vm3, %v6625_v3 }
 0x436   :  { %6085 = vmatpush3.bf16.msk.msra.mxu0 %vm7356_vm3, %v6625_v3 }
 0x437   :  { %6087 = vmatprep.subr.msk.bf16.mxu0 %vm7366_vm15, %v6625_v3 }
 0x43a   :  { %6089 = vmatpush3.bf16.msk.msra.mxu0 %vm7366_vm15, %v6625_v3 }
 0x4ed   :  { %v1370_v19 = vpop.f32.mrb[24].mxu1  ;;  %v1423_v9 = vpop.f32.mrb[20].mxu0 }
 0x4ee   :  { %v1372_v15 = vpop.f32.mrb[25].mxu1  ;;  %v1425_v16 = vpop.f32.mrb[21].mxu0 }
 0x4ef   :  { %v1374_v20 = vpop.f32.mrb[26].mxu1  ;;  %v1427_v21 = vpop.f32.mrb[22].mxu0 }
 0x4f0   :  { %v6034_v24 = vpack.c.bf16 %v1374_v20, %v1370_v19  ;;  %v6042_v27 = vpack.c.bf16 %v1427_v21, %v1423_v9  ;;  %v1376_v28 = vpop.f32.mrb[27].mxu1  ;;  %v1429_v29 = vpop.f32.mrb[23].mxu0  ;;  %v6626_v20 = vmov 0.0   ;;  %v6475_v21 = vld [vmem:[%s8260_s9 + $0x8] ss:$12 sps:$4 sm:$0xff]  }
 0x4f1   :  { %v6026_v31 = vpack.c.bf16 %v1376_v28, %v1372_v15  ;;  %v6050_v32 = vpack.c.bf16 %v1429_v29, %v1425_v16  ;;  %v6474_v15 = vld [vmem:[%s8260_s9 + $0x4] ss:$12 sps:$4 sm:$0xff]   ;;  %v6472_v16 = vld [vmem:[%s8260_s9] ss:$12 sps:$4 sm:$0xff]  }
 0x4f2   :  { %2203 = vmatprep.subr.bf16.mxu0 %v6474_v15  ;;  %v6479_v28 = vld [vmem:[%s8260_s9 + $0x20] ss:$12 sps:$4 sm:$0xff]   ;;  %v6480_v29 = vld [vmem:[%s8260_s9 + $0x30] ss:$12 sps:$4 sm:$0xff]  }
 0x4f3   :  { %6027 = vmatprep.subr.bf16.mxu1 %v6026_v31 }
 0x4f4   :  { %6029 = vmatpush3.bf16.msra.mxu1 %v6026_v31  ;;  %v6482_v31 = vld [vmem:[%s8260_s9 + $0x34] ss:$12 sps:$4 sm:$0xff]  }
 0x4f5   :  { %v1380_v33 = vpop.f32.mrb[28].mxu1  ;;  %v1433_v35 = vpop.f32.mrb[24].mxu0 }
 0x4f6   :  { %v1382_v37 = vpop.f32.mrb[29].mxu1  ;;  %v1435_v38 = vpop.f32.mrb[25].mxu0 }
 0x4f7   :  { %v1384_v39 = vpop.f32.mrb[30].mxu1  ;;  %v1437_v40 = vpop.f32.mrb[26].mxu0 }
 0x4f8   :  { %v6038_v41 = vpack.c.bf16 %v1384_v39, %v1380_v33  ;;  %v6046_v43 = vpack.c.bf16 %v1437_v40, %v1433_v35  ;;  %v1386_v30 = vpop.f32.mrb[31].mxu1  ;;  %v1439_v45 = vpop.f32.mrb[27].mxu0  ;;  %v6486_v33 = vld [vmem:[%s8260_s9 + $0x4c] ss:$12 sps:$4 sm:$0xff]   ;;  %v6484_v35 = vld [vmem:[%s8260_s9 + $0x48] ss:$12 sps:$4 sm:$0xff]  }
 0x4f9   :  { %v6030_v46 = vpack.c.bf16 %v1386_v30, %v1382_v37  ;;  %v6054_v34 = vpack.c.bf16 %v1439_v45, %v1435_v38  ;;  %v6487_v37 = vld [vmem:[%s8260_s9 + $0x50] ss:$12 sps:$4 sm:$0xff]   ;;  %v6488_v39 = vld [vmem:[%s8260_s9 + $0x60] ss:$12 sps:$4 sm:$0xff]   ;;  %v6491_v40 = vld [vmem:[%s8260_s9 + $0x68] ss:$12 sps:$4 sm:$0xff]  }
 0x4fa   :  { %v6490_v38 = vld [vmem:[%s8260_s9 + $0x64] ss:$12 sps:$4 sm:$0xff]   ;;  %v6495_v30 = vld [vmem:[%s8260_s9 + $0x80] ss:$12 sps:$4 sm:$0xff]  }
 0x4fb   :  { %6031 = vmatprep.subr.bf16.mxu1 %v6030_v46  ;;  %v6498_v45 = vld [vmem:[%s8260_s9 + $0x94] ss:$12 sps:$4 sm:$0xff]  }
 0x4fc   :  { %6033 = vmatpush3.bf16.msra.mxu1 %v6030_v46  ;;  %v6496_v46 = vld [vmem:[%s8260_s9 + $0x90] ss:$12 sps:$4 sm:$0xff]  }
 0x4fd   :  { %6035 = vmatprep.subr.bf16.mxu1 %v6034_v24 }
 0x4ff   :  { %5486 = vmatmul.mubr.msk.f32.vlgmr.msra.gmra.mrb[32].mxu1 %vm8326_vm0, %v4689_v36  ;;  %v6502_v36 = vld [vmem:[%s8260_s9 + $0xac] ss:$12 sps:$4 sm:$0xff]  }
 0x500   :  { %6037 = vmatpush3.bf16.msra.mxu1 %v6034_v24  ;;  %5496 = vmatprep.mubr.msk.f32.mxu1 %vm8327_vm11, %v1442_v50  ;;  %vm8330_vm11 = vmmov %vm8326_vm0  ;;  %v6478_v24 = vld [vmem:[%s8260_s9 + $0x1c] ss:$12 sps:$4 sm:$0xff]  }
 0x501   :  { %6039 = vmatprep.subr.bf16.mxu1 %v6038_v41  ;;  %v6500_v50 = vld [vmem:[%s8260_s9 + $0xa8] ss:$12 sps:$4 sm:$0xff]  }
 0x504   :  { %6041 = vmatpush3.bf16.msra.mxu1 %v6038_v41  ;;  %v6494_v41 = vld [vmem:[%s8260_s9 + $0x7c] ss:$12 sps:$4 sm:$0xff]  }
 0x505   :  { %6043 = vmatprep.subr.bf16.mxu1 %v6042_v27 }
 0x507   :  { %5497 = vmatmul.mubr.msk.f32.vlgmr.msra.gmra.mrb[32].mxu1 %vm8328_vm1, %v1443_v42  ;;  %vm8331_vm1 = vmmov %vm8326_vm0  ;;  %v6503_v42 = vld [vmem:[%s8260_s9 + $0xb0] ss:$12 sps:$4 sm:$0xff]  }
 0x508   :  { %6045 = vmatpush3.bf16.msra.mxu1 %v6042_v27  ;;  %5507 = vmatprep.mubr.msk.f32.mxu1 %vm8329_vm2, %v4694_v62  ;;  %v6476_v27 = vld [vmem:[%s8260_s9 + $0x18] ss:$12 sps:$4 sm:$0xff]   ;;  %vm6627_vm2 = vmmov 0  }
 0x509   :  { %6047 = vmatprep.subr.bf16.mxu1 %v6046_v43 }
 0x50c   :  { %6049 = vmatpush3.bf16.msra.mxu1 %v6046_v43  ;;  %v6492_v43 = vld [vmem:[%s8260_s9 + $0x78] ss:$12 sps:$4 sm:$0xff]  }
 0x50d   :  { %6051 = vmatprep.subr.bf16.mxu1 %v6050_v32 }
 0x50f   :  { %5508 = vmatmul.mubr.msk.f32.vlgmr.msra.gmra.mrb[32].mxu1 %vm8326_vm0, %v4695_v0  ;;  %vm2292_vm0 = vcmask 130048  }
 0x510   :  { %6053 = vmatpush3.bf16.msra.mxu1 %v6050_v32  ;;  %5518 = vmatprep.mubr.msk.f32.mxu1 %vm8330_vm11, %v4698_v2  ;;  %v6483_v32 = vld [vmem:[%s8260_s9 + $0x38] ss:$12 sps:$4 sm:$0xff]   ;;  %vm8344_vm11 = vmmov %vm8331_vm1 }
 0x511   :  { %6055 = vmatprep.subr.bf16.mxu1 %v6054_v34 }
 0x514   :  { %6057 = vmatpush3.bf16.msra.mxu1 %v6054_v34  ;;  %v6499_v34 = vld [vmem:[%s8260_s9 + $0x98] ss:$12 sps:$4 sm:$0xff]  }
 0x515   :  { %6091 = vmatprep.subr.msk.bf16.mxu1 %vm7289_vm5, %v6625_v3 }
 0x517   :  { %5519 = vmatmul.mubr.msk.f32.vlgmr.msra.gmra.mrb[32].mxu1 %vm8331_vm1, %v4699_v8 }
 0x518   :  { %6093 = vmatpush3.bf16.msk.msra.mxu1 %vm7289_vm5, %v6625_v3 }
 0x519   :  { %6095 = vmatprep.subr.msk.bf16.mxu1 %vm7296_vm10, %v6625_v3 }
 0x51c   :  { %6097 = vmatpush3.bf16.msk.msra.mxu1 %vm7296_vm10, %v6625_v3 }
 0x51d   :  { %6099 = vmatprep.subr.msk.bf16.mxu1 %vm7308_vm14, %v6625_v3 }
 0x520   :  { %6101 = vmatpush3.bf16.msk.msra.mxu1 %vm7308_vm14, %v6625_v3 }
 0x521   :  { %6103 = vmatprep.subr.msk.bf16.mxu1 %vm7320_vm7, %v6625_v3 }
 0x524   :  { %6105 = vmatpush3.bf16.msk.msra.mxu1 %vm7320_vm7, %v6625_v3 }
 0x525   :  { %6107 = vmatprep.subr.msk.bf16.mxu1 %vm7332_vm13, %v6625_v3 }
 0x528   :  { %6109 = vmatpush3.bf16.msk.msra.mxu1 %vm7332_vm13, %v6625_v3 }
 0x529   :  { %6111 = vmatprep.subr.msk.bf16.mxu1 %vm7344_vm8, %v6625_v3 }
 0x52c   :  { %6113 = vmatpush3.bf16.msk.msra.mxu1 %vm7344_vm8, %v6625_v3 }
 0x52d   :  { %6115 = vmatprep.subr.msk.bf16.mxu1 %vm7356_vm3, %v6625_v3 }
 0x530   :  { %6117 = vmatpush3.bf16.msk.msra.mxu1 %vm7356_vm3, %v6625_v3 }
 0x531   :  { %6119 = vmatprep.subr.msk.bf16.mxu1 %vm7366_vm15, %v6625_v3 }
 0x534   :  { %6121 = vmatpush3.bf16.msk.msra.mxu1 %vm7366_vm15, %v6625_v3 }
 0x535   :  { %5591 = vmatprep.subr.bf16.mxu1 %v6626_v20 }
 0x5ea   :  { %v7455_v51 = vpop.f32.mrb[32].mxu1 }
 0x5eb   :  { %v7457_v57 = vpop.f32.mrb[33].mxu1 }
 0x5ec   :  { %5553 = vmatprep.mubr.f32.mxu0 %v7457_v57 }
 0x5ed   :  { %5554 = vmatmul.mubr.f32.vlgmr.msra.gmra.mrb[28].mxu0 %v7455_v51 }
 0x5ee   :  { %2235 = vmatprep.mubr.bf16.mxu0 %v6624_v1  ;;  %2204 = vmatpush1.bf16.msra.mxu0 %v6472_v16 }
 0x5ef   :  { %2205 = vmatprep.subr.bf16.mxu0 %v6478_v24 }
 0x5f2   :  { %2206 = vmatpush1.bf16.msra.mxu0 %v6476_v27 }
 0x5f3   :  { %2207 = vmatprep.subr.bf16.mxu0 %v6482_v31 }
 0x5f6   :  { %2208 = vmatpush1.bf16.msra.mxu0 %v6480_v29 }
 0x5f7   :  { %2209 = vmatprep.subr.bf16.mxu0 %v6486_v33 }
 0x5fa   :  { %2210 = vmatpush1.bf16.msra.mxu0 %v6484_v35 }
 0x5fb   :  { %2211 = vmatprep.subr.bf16.mxu0 %v6490_v38 }
 0x5fe   :  { %2212 = vmatpush1.bf16.msra.mxu0 %v6488_v39 }
 0x5ff   :  { %2213 = vmatprep.subr.bf16.mxu0 %v6494_v41 }
 0x602   :  { %2214 = vmatpush1.bf16.msra.mxu0 %v6492_v43 }
 0x603   :  { %2215 = vmatprep.subr.bf16.mxu0 %v6498_v45  ;;  %v2287_v45 = vld [vmem:[%s8263_s10] sm:$0xff] }
 0x606   :  { %2216 = vmatpush1.bf16.msra.mxu0 %v6496_v46  ;;  %v2288_v46 = vld [vmem:[%s8263_s10 + $0x8] sm:$0xff] }
 0x607   :  { %2217 = vmatprep.subr.bf16.mxu0 %v6502_v36  ;;  %v4781_v36 = vld [vmem:[%s8263_s10 + $0x28] sm:$0xff] }
 0x60a   :  { %2218 = vmatpush1.bf16.msra.mxu0 %v6500_v50 }
 0x6c0   :  { %v5555_v58 = vpop.f32.mrb[28].mxu0 }
 0x6c1   :  { %v1913_v44 = vpop.f32.mrb[29].mxu0 }
 0x6c2   :  { %v1922_v48 = vadd.f32 %v5555_v58, %v1913_v44 }
 0x6c4   :  { %v1923_v49 = vrot.slane %v1922_v48, 4 }
 0x6c6   :  { %v1924_v53 = vadd.f32 %v1923_v49, %v1922_v48 }
 0x6c8   :  { %v1925_v54 = vrot.slane %v1924_v53, 2 }
 0x6ca   :  { %v1926_v56 = vadd.f32 %v1925_v54, %v1924_v53 }
 0x6cc   :  { %v1927_v59 = vrot.slane %v1926_v56, 1 }
 0x6ce   :  { %v1928_v6 = vadd.f32 %v1927_v59, %v1926_v56  ;;  %v2017_v59 = vld [vmem:[%s8261_s7] sm:$0x1] }
 0x6d0   :  { %v7462_v10 = vmul.f32 0.0078125, %v1928_v6 }
 0x6d2   :  { %v1930_v61 = vsub.f32 %v7457_v57, %v7462_v10  ;;  %v1931_v13 = vsub.f32 %v7455_v51, %v7462_v10 }
 0x6d4   :  { %v1932_v19 = vmul.f32 %v1930_v61, %v1930_v61  ;;  %v1933_v9 = vmul.f32 %v1931_v13, %v1931_v13  ;;  %v2021_v13 = vld [vmem:[%s8262_s8] sm:$0x1] }
 0x6d6   :  { %5588 = vmatprep.mubr.f32.mxu1 %v1932_v19 }
 0x6d7   :  { %5589 = vmatmul.mubr.f32.vlgmr.msra.gmra.mrb[34].mxu1 %v1933_v9 }
 0x6d8   :  { %5592 = vmatpush3.bf16.msra.mxu1 %v6475_v21  ;;  %5607 = vmatprep.mubr.msk.bf16.mxu1 %vm6627_vm2, %v6626_v20  ;;  %vm8345_vm2 = vmmov %vm8331_vm1 }
 0x6d9   :  { %5593 = vmatprep.subr.bf16.mxu1 %v6626_v20 }
 0x6dc   :  { %5594 = vmatpush3.bf16.msra.mxu1 %v6479_v28 }
 0x6dd   :  { %5595 = vmatprep.subr.bf16.mxu1 %v6626_v20 }
 0x6e0   :  { %5596 = vmatpush3.bf16.msra.mxu1 %v6483_v32 }
 0x6e1   :  { %5597 = vmatprep.subr.bf16.mxu1 %v6626_v20 }
 0x6e4   :  { %5598 = vmatpush3.bf16.msra.mxu1 %v6487_v37 }
 0x6e5   :  { %5599 = vmatprep.subr.bf16.mxu1 %v6626_v20 }
 0x6e8   :  { %5600 = vmatpush3.bf16.msra.mxu1 %v6491_v40 }
 0x6e9   :  { %5601 = vmatprep.subr.bf16.mxu1 %v6626_v20 }
 0x6ec   :  { %5602 = vmatpush3.bf16.msra.mxu1 %v6495_v30  ;;  %v4775_v30 = vld [vmem:[%s8263_s10 + $0x18] sm:$0xff] }
 0x6ed   :  { %5603 = vmatprep.subr.bf16.mxu1 %v6626_v20 }
 0x6f0   :  { %5604 = vmatpush3.bf16.msra.mxu1 %v6499_v34  ;;  %v4780_v34 = vld [vmem:[%s8263_s10 + $0x20] sm:$0xff] }
 0x6f1   :  { %5605 = vmatprep.subr.bf16.mxu1 %v6626_v20 }
 0x6f4   :  { %5606 = vmatpush3.bf16.msra.mxu1 %v6503_v42 }
 0x6f5   :  { %6167 = vmatprep.subr.msk.bf16.mxu1 %vm7289_vm5, %v6625_v3 }
 0x7aa   :  { %v5590_v62 = vpop.f32.mrb[34].mxu1 }
 0x7ab   :  { %v2000_v0 = vpop.f32.mrb[35].mxu1 }
 0x7ac   :  { %v2009_v2 = vadd.f32 %v5590_v62, %v2000_v0 }
 0x7ae   :  { %v2010_v8 = vrot.slane %v2009_v2, 4 }
 0x7b0   :  { %v2011_v58 = vadd.f32 %v2010_v8, %v2009_v2 }
 0x7b2   :  { %v2012_v44 = vrot.slane %v2011_v58, 2 }
 0x7b4   :  { %v2013_v48 = vadd.f32 %v2012_v44, %v2011_v58 }
 0x7b6   :  { %v2014_v49 = vrot.slane %v2013_v48, 1 }
 0x7b8   :  { %v2015_v53 = vadd.f32 %v2014_v49, %v2013_v48  ;;  %v6506_v48 = vld [vmem:[%s8264_s13 + $0x4] ss:$16 sps:$4 sm:$0xff]   ;;  %v6504_v49 = vld [vmem:[%s8264_s13] ss:$16 sps:$4 sm:$0xff]  }
 0x7ba   :  { %v2016_v54 = vmul.f32 0.0078125, %v2015_v53  ;;  %v6507_v53 = vld [vmem:[%s8264_s13 + $0x8] ss:$16 sps:$4 sm:$0xff]  }
 0x7bc   :  { %v2018_v56 = vadd.f32 1e-05, %v2016_v54  ;;  %v6509_v54 = vld [vmem:[%s8264_s13 + $0xc] ss:$16 sps:$4 sm:$0xff]  }
 0x7be   :  { %6602 = vrsqrt.f32 %v2018_v56  ;;  %v6512_v56 = vld [vmem:[%s8264_s13 + $0x24] ss:$16 sps:$4 sm:$0xff]  }
 0x7c8   :  { %v6603_v6 = vpop.eup %6602 }
 0x7c9   :  { %v2020_v61 = vmul.f32 %v6603_v6, %v2017_v59  ;;  %v6515_v59 = vld [vmem:[%s8264_s13 + $0x2c] ss:$16 sps:$4 sm:$0xff]   ;;  %v6510_v6 = vld [vmem:[%s8264_s13 + $0x20] ss:$16 sps:$4 sm:$0xff]  }
 0x7cb   :  { %v2022_v19 = vmul.f32 %v2020_v61, %v7462_v10  ;;  %v2028_v9 = vrot.slane %v2020_v61, %v7264_v23  ;;  %v6513_v61 = vld [vmem:[%s8264_s13 + $0x28] ss:$16 sps:$4 sm:$0xff]  }
 0x7cd   :  { %v2023_v15 = vsub.f32 %v2021_v13, %v2022_v19  ;;  %v2030_v16 = vmul.f32 %v2028_v9, %v7457_v57  ;;  %v2031_v20 = vmul.f32 %v7455_v51, %v2028_v9  ;;  %v4774_v51 = vld [vmem:[%s8263_s10 + $0x10] sm:$0xff]  ;;  %v6521_v9 = vld [vmem:[%s8264_s13 + $0x4c] ss:$16 sps:$4 sm:$0xff]  }
 0x7ce   :  { %v6518_v13 = vld [vmem:[%s8264_s13 + $0x44] ss:$16 sps:$4 sm:$0xff]   ;;  %v6516_v19 = vld [vmem:[%s8264_s13 + $0x40] ss:$16 sps:$4 sm:$0xff]  }
 0x7cf   :  { %v2036_v21 = vrot.slane %v2023_v15, %v7264_v23  ;;  %v6519_v15 = vld [vmem:[%s8264_s13 + $0x48] ss:$16 sps:$4 sm:$0xff]  }
 0x7d1   :  { %v7554_v24 = vadd.f32 %v2036_v21, %v2030_v16  ;;  %v7556_v27 = vadd.f32 %v2036_v21, %v2031_v20  ;;  %v6524_v16 = vld [vmem:[%s8264_s13 + $0x64] ss:$16 sps:$4 sm:$0xff]   ;;  %v6527_v20 = vld [vmem:[%s8264_s13 + $0x6c] ss:$16 sps:$4 sm:$0xff]   ;;  %v6522_v21 = vld [vmem:[%s8264_s13 + $0x60] ss:$16 sps:$4 sm:$0xff]  }
 0x7d3   :  { %v2040_v28 = vmax.f32 %v7554_v24, 0.0  ;;  %v2041_v29 = vmax.f32 %v7556_v27, 0.0  ;;  %v4848_v24 = vld [vmem:[%s8267_s14 + $0x20] sm:$0xff] }
 0x7d5   :  { %v2042_v10 = vpack.c.bf16 %v2041_v29, %v2040_v28 }
 0x7d7   :  { %2236 = vmatmul.mubr.bf16.vlgmr.msra.gmra.mrb[32].mxu0 %v2042_v10  ;;  %5608 = vmatmul.mubr.bf16.vlgmr.msra.gmra.mrb[36].mxu1 %v2042_v10  ;;  %v6530_v10 = vld [vmem:[%s8264_s13 + $0x84] ss:$16 sps:$4 sm:$0xff]  }
 0x7d8   :  { %6169 = vmatpush3.bf16.msk.msra.mxu1 %vm7289_vm5, %v6625_v3  ;;  %5615 = vmatprep.mubr.msk.f32.mxu0 %vm2292_vm0, %v4774_v51  ;;  %v6525_v51 = vld [vmem:[%s8264_s13 + $0x68] ss:$16 sps:$4 sm:$0xff]  }
 0x7d9   :  { %6171 = vmatprep.subr.msk.bf16.mxu1 %vm7296_vm10, %v6625_v3 }
 0x7dc   :  { %6173 = vmatpush3.bf16.msk.msra.mxu1 %vm7296_vm10, %v6625_v3 }
 0x7dd   :  { %6175 = vmatprep.subr.msk.bf16.mxu1 %vm7308_vm14, %v6625_v3 }
 0x7e0   :  { %6177 = vmatpush3.bf16.msk.msra.mxu1 %vm7308_vm14, %v6625_v3 }
 0x7e1   :  { %6179 = vmatprep.subr.msk.bf16.mxu1 %vm7320_vm7, %v6625_v3 }
 0x7e4   :  { %6181 = vmatpush3.bf16.msk.msra.mxu1 %vm7320_vm7, %v6625_v3 }
 0x7e5   :  { %6183 = vmatprep.subr.msk.bf16.mxu1 %vm7332_vm13, %v6625_v3 }
 0x7e8   :  { %6185 = vmatpush3.bf16.msk.msra.mxu1 %vm7332_vm13, %v6625_v3 }
 0x7e9   :  { %6187 = vmatprep.subr.msk.bf16.mxu1 %vm7344_vm8, %v6625_v3 }
 0x7ec   :  { %6189 = vmatpush3.bf16.msk.msra.mxu1 %vm7344_vm8, %v6625_v3 }
 0x7ed   :  { %6191 = vmatprep.subr.msk.bf16.mxu1 %vm7356_vm3, %v6625_v3 }
 0x7f0   :  { %6193 = vmatpush3.bf16.msk.msra.mxu1 %vm7356_vm3, %v6625_v3 }
 0x7f1   :  { %6195 = vmatprep.subr.msk.bf16.mxu1 %vm7366_vm15, %v6625_v3 }
 0x7f4   :  { %6197 = vmatpush3.bf16.msk.msra.mxu1 %vm7366_vm15, %v6625_v3 }
 0x7f5   :  { %2974 = vmatprep.subr.bf16.mxu1 %v6509_v54 }
 0x8aa   :  { %v2237_v57 = vpop.f32.mrb[32].mxu0  ;;  %v2280_v31 = vpop.f32.mrb[36].mxu1 }
 0x8ab   :  { %v2239_v32 = vpop.f32.mrb[33].mxu0  ;;  %v5609_v33 = vpop.f32.mrb[37].mxu1 }
 0x8ac   :  { %v2241_v35 = vpop.f32.mrb[34].mxu0  ;;  %v2283_v37 = vpop.f32.mrb[38].mxu1  ;;  %v6531_v33 = vld [vmem:[%s8264_s13 + $0x88] ss:$16 sps:$4 sm:$0xff]  }
 0x8ad   :  { %v6126_v38 = vpack.c.bf16 %v2241_v35, %v2237_v57  ;;  %v6130_v39 = vpack.c.bf16 %v2283_v37, %v2280_v31  ;;  %v2243_v40 = vpop.f32.mrb[35].mxu0  ;;  %v5610_v41 = vpop.f32.mrb[39].mxu1  ;;  %v6533_v57 = vld [vmem:[%s8264_s13 + $0x8c] ss:$16 sps:$4 sm:$0xff]   ;;  %v6528_v31 = vld [vmem:[%s8264_s13 + $0x80] ss:$16 sps:$4 sm:$0xff]  }
 0x8ae   :  { %v6122_v43 = vpack.c.bf16 %v2243_v40, %v2239_v32  ;;  %v6536_v32 = vld [vmem:[%s8264_s13 + $0xa4] ss:$16 sps:$4 sm:$0xff]   ;;  %v6539_v35 = vld [vmem:[%s8264_s13 + $0xac] ss:$16 sps:$4 sm:$0xff]   ;;  %v6534_v37 = vld [vmem:[%s8264_s13 + $0xa0] ss:$16 sps:$4 sm:$0xff]  }
 0x8af   :  { %v6545_v40 = vld [vmem:[%s8264_s13 + $0xcc] ss:$16 sps:$4 sm:$0xff]   ;;  %v6540_v41 = vld [vmem:[%s8264_s13 + $0xc0] ss:$16 sps:$4 sm:$0xff]  }
 0x8b0   :  { %6123 = vmatprep.subr.bf16.mxu0 %v6122_v43 }
 0x8b1   :  { %6125 = vmatpush3.bf16.msra.mxu0 %v6122_v43  ;;  %v6548_v43 = vld [vmem:[%s8264_s13 + $0xe4] ss:$16 sps:$4 sm:$0xff]  }
 0x8b2   :  { %6127 = vmatprep.subr.bf16.mxu0 %v6126_v38 }
 0x8b4   :  { %5616 = vmatmul.mubr.msk.f32.vlgmr.msra.gmra.mrb[30].mxu0 %vm2292_vm0, %v4775_v30  ;;  %v6543_v30 = vld [vmem:[%s8264_s13 + $0xc8] ss:$16 sps:$4 sm:$0xff]  }
 0x8b5   :  { %6129 = vmatpush3.bf16.msra.mxu0 %v6126_v38  ;;  %5622 = vmatprep.mubr.msk.f32.mxu0 %vm2292_vm0, %v2287_v45  ;;  %v6542_v38 = vld [vmem:[%s8264_s13 + $0xc4] ss:$16 sps:$4 sm:$0xff]   ;;  %v6551_v45 = vld [vmem:[%s8264_s13 + $0xec] ss:$16 sps:$4 sm:$0xff]  }
 0x8b6   :  { %6131 = vmatprep.subr.bf16.mxu0 %v6130_v39 }
 0x8bc   :  { %5623 = vmatmul.mubr.msk.f32.vlgmr.msra.gmra.mrb[30].mxu0 %vm2292_vm0, %v2288_v46  ;;  %v6546_v46 = vld [vmem:[%s8264_s13 + $0xe0] ss:$16 sps:$4 sm:$0xff]  }
 0x8bd   :  { %6133 = vmatpush3.bf16.msra.mxu0 %v6130_v39  ;;  %5629 = vmatprep.mubr.msk.f32.mxu0 %vm2292_vm0, %v4780_v34  ;;  %v6537_v39 = vld [vmem:[%s8264_s13 + $0xa8] ss:$16 sps:$4 sm:$0xff]  }
 0x8be   :  { %6135 = vmatprep.subr.msk.bf16.mxu0 %vm7289_vm5, %v6625_v3  ;;  %v6549_v34 = vld [vmem:[%s8264_s13 + $0xe8] ss:$16 sps:$4 sm:$0xff]  }
 0x8c4   :  { %5630 = vmatmul.mubr.msk.f32.vlgmr.msra.gmra.mrb[30].mxu0 %vm2292_vm0, %v4781_v36 }
 0x8c5   :  { %6137 = vmatpush3.bf16.msk.msra.mxu0 %vm7289_vm5, %v6625_v3  ;;  %vm8340_vm5 = vmmov %vm8331_vm1 }
 0x8c6   :  { %6139 = vmatprep.subr.msk.bf16.mxu0 %vm7296_vm10, %v6625_v3 }
 0x8c9   :  { %6141 = vmatpush3.bf16.msk.msra.mxu0 %vm7296_vm10, %v6625_v3  ;;  %vm8341_vm10 = vmmov %vm8331_vm1 }
 0x8ca   :  { %6143 = vmatprep.subr.msk.bf16.mxu0 %vm7308_vm14, %v6625_v3 }
 0x8cd   :  { %6145 = vmatpush3.bf16.msk.msra.mxu0 %vm7308_vm14, %v6625_v3  ;;  %vm8342_vm14 = vmmov %vm8331_vm1 }
 0x8ce   :  { %6147 = vmatprep.subr.msk.bf16.mxu0 %vm7320_vm7, %v6625_v3 }
 0x8d1   :  { %6149 = vmatpush3.bf16.msk.msra.mxu0 %vm7320_vm7, %v6625_v3  ;;  %vm8343_vm7 = vmmov %vm8331_vm1 }
 0x8d2   :  { %6151 = vmatprep.subr.msk.bf16.mxu0 %vm7332_vm13, %v6625_v3 }
 0x8d5   :  { %6153 = vmatpush3.bf16.msk.msra.mxu0 %vm7332_vm13, %v6625_v3  ;;  %vm8335_vm13 = vnez %v8308_v26 }
 0x8d6   :  { %6155 = vmatprep.subr.msk.bf16.mxu0 %vm7344_vm8, %v6625_v3 }
 0x8d9   :  { %6157 = vmatpush3.bf16.msk.msra.mxu0 %vm7344_vm8, %v6625_v3  ;;  %vm8334_vm8 = vnez %v8306_v25 }
 0x8da   :  { %6159 = vmatprep.subr.msk.bf16.mxu0 %vm7356_vm3, %v6625_v3 }
 0x8dd   :  { %6161 = vmatpush3.bf16.msk.msra.mxu0 %vm7356_vm3, %v6625_v3  ;;  %vm8333_vm3 = vnez %v8304_v22 }
 0x8de   :  { %6163 = vmatprep.subr.msk.bf16.mxu0 %vm7366_vm15, %v6625_v3 }
 0x8e1   :  { %6165 = vmatpush3.bf16.msk.msra.mxu0 %vm7366_vm15, %v6625_v3  ;;  %vm8332_vm15 = vnez %v8302_v17 }
 0x8e2   :  { %2931 = vmatprep.subr.bf16.mxu0 %v6506_v48  ;;  %v2715_v48 = vld [vmem:[%s8266_s12] sm:$0x1] }
 0x997   :  { %v7681_v60 = vpop.f32.mrb[30].mxu0 }
 0x998   :  { %v7683_v47 = vpop.f32.mrb[31].mxu0 }
 0x999   :  { %5664 = vmatprep.mubr.f32.mxu0 %v7683_v47 }
 0x99a   :  { %5665 = vmatmul.mubr.f32.vlgmr.msra.gmra.mrb[36].mxu0 %v7681_v60 }
 0x99b   :  { %2963 = vmatprep.mubr.bf16.mxu0 %v6624_v1  ;;  %2932 = vmatpush1.bf16.msra.mxu0 %v6504_v49 }
 0x99c   :  { %2933 = vmatprep.subr.bf16.mxu0 %v6512_v56 }
 0x99f   :  { %2934 = vmatpush1.bf16.msra.mxu0 %v6510_v6 }
 0x9a0   :  { %2935 = vmatprep.subr.bf16.mxu0 %v6518_v13 }
 0x9a3   :  { %2936 = vmatpush1.bf16.msra.mxu0 %v6516_v19 }
 0x9a4   :  { %2937 = vmatprep.subr.bf16.mxu0 %v6524_v16 }
 0x9a7   :  { %2938 = vmatpush1.bf16.msra.mxu0 %v6522_v21 }
 0x9a8   :  { %2939 = vmatprep.subr.bf16.mxu0 %v6530_v10 }
 0x9ab   :  { %2940 = vmatpush1.bf16.msra.mxu0 %v6528_v31 }
 0x9ac   :  { %2941 = vmatprep.subr.bf16.mxu0 %v6536_v32 }
 0x9af   :  { %2942 = vmatpush1.bf16.msra.mxu0 %v6534_v37  ;;  %v4851_v37 = vld [vmem:[%s8267_s14 + $0x38] sm:$0xff] }
 0x9b0   :  { %2943 = vmatprep.subr.bf16.mxu0 %v6542_v38  ;;  %v3017_v38 = vld [vmem:[%s8267_s14] sm:$0xff] }
 0x9b3   :  { %2944 = vmatpush1.bf16.msra.mxu0 %v6540_v41  ;;  %v3020_v41 = vld [vmem:[%s8267_s14 + $0x18] sm:$0xff] }
 0x9b4   :  { %2945 = vmatprep.subr.bf16.mxu0 %v6548_v43  ;;  %v4860_v43 = vld [vmem:[%s8267_s14 + $0x40] sm:$0xff] }
 0x9b7   :  { %2946 = vmatpush1.bf16.msra.mxu0 %v6546_v46  ;;  %v4863_v46 = vld [vmem:[%s8267_s14 + $0x58] sm:$0xff] }
 0xa6d   :  { %v5666_v52 = vpop.f32.mrb[36].mxu0 }
 0xa6e   :  { %v2607_v55 = vpop.f32.mrb[37].mxu0 }
 0xa6f   :  { %v2616_v5 = vadd.f32 %v5666_v52, %v2607_v55 }
 0xa71   :  { %v2617_v11 = vrot.slane %v2616_v5, 4 }
 0xa73   :  { %v2618_v14 = vadd.f32 %v2617_v11, %v2616_v5 }
 0xa75   :  { %v2619_v50 = vrot.slane %v2618_v14, 2 }
 0xa77   :  { %v2620_v42 = vadd.f32 %v2619_v50, %v2618_v14 }
 0xa79   :  { %v2621_v62 = vrot.slane %v2620_v42, 1 }
 0xa7b   :  { %v2622_v18 = vadd.f32 %v2621_v62, %v2620_v42 }
 0xa7d   :  { %v7688_v0 = vmul.f32 0.0078125, %v2622_v18 }
 0xa7f   :  { %v2624_v2 = vsub.f32 %v7683_v47, %v7688_v0  ;;  %v2625_v8 = vsub.f32 %v7681_v60, %v7688_v0 }
 0xa81   :  { %v2626_v58 = vmul.f32 %v2624_v2, %v2624_v2  ;;  %v2627_v44 = vmul.f32 %v2625_v8, %v2625_v8  ;;  %v2711_v8 = vld [vmem:[%s8265_s11] sm:$0x1] }
 0xa83   :  { %5699 = vmatprep.mubr.f32.mxu1 %v2626_v58 }
 0xa84   :  { %5700 = vmatmul.mubr.f32.vlgmr.msra.gmra.mrb[40].mxu1 %v2627_v44 }
 0xa85   :  { %3006 = vmatprep.mubr.bf16.mxu1 %v6624_v1  ;;  %2975 = vmatpush1.bf16.msra.mxu1 %v6507_v53 }
 0xa86   :  { %2976 = vmatprep.subr.bf16.mxu1 %v6515_v59 }
 0xa89   :  { %2977 = vmatpush1.bf16.msra.mxu1 %v6513_v61 }
 0xa8a   :  { %2978 = vmatprep.subr.bf16.mxu1 %v6521_v9 }
 0xa8d   :  { %2979 = vmatpush1.bf16.msra.mxu1 %v6519_v15 }
 0xa8e   :  { %2980 = vmatprep.subr.bf16.mxu1 %v6527_v20 }
 0xa91   :  { %2981 = vmatpush1.bf16.msra.mxu1 %v6525_v51 }
 0xa92   :  { %2982 = vmatprep.subr.bf16.mxu1 %v6533_v57 }
 0xa95   :  { %2983 = vmatpush1.bf16.msra.mxu1 %v6531_v33  ;;  %v4849_v33 = vld [vmem:[%s8267_s14 + $0x28] sm:$0xff] }
 0xa96   :  { %2984 = vmatprep.subr.bf16.mxu1 %v6539_v35  ;;  %v4850_v35 = vld [vmem:[%s8267_s14 + $0x30] sm:$0xff] }
 0xa99   :  { %2985 = vmatpush1.bf16.msra.mxu1 %v6537_v39  ;;  %v3018_v39 = vld [vmem:[%s8267_s14 + $0x8] sm:$0xff] }
 0xa9a   :  { %2986 = vmatprep.subr.bf16.mxu1 %v6545_v40  ;;  %v3019_v40 = vld [vmem:[%s8267_s14 + $0x10] sm:$0xff] }
 0xa9d   :  { %2987 = vmatpush1.bf16.msra.mxu1 %v6543_v30  ;;  %v4861_v30 = vld [vmem:[%s8267_s14 + $0x48] sm:$0xff] }
 0xa9e   :  { %2988 = vmatprep.subr.bf16.mxu1 %v6551_v45  ;;  %v4862_v45 = vld [vmem:[%s8267_s14 + $0x50] sm:$0xff] }
 0xaa1   :  { %2989 = vmatpush1.bf16.msra.mxu1 %v6549_v34  ;;  %v4868_v34 = vld [vmem:[%s8267_s14 + $0x60] sm:$0xff] }
 0xaa2   :  { %6215 = vmatprep.subr.msk.bf16.mxu1 %vm6897_vm4, %v6625_v3 }
 0xb57   :  { %v5701_v36 = vpop.f32.mrb[40].mxu1 }
 0xb58   :  { %v2694_v52 = vpop.f32.mrb[41].mxu1 }
 0xb59   :  { %v2703_v55 = vadd.f32 %v5701_v36, %v2694_v52  ;;  %v4869_v36 = vld [vmem:[%s8267_s14 + $0x68] sm:$0xff]  ;;  %v4870_v52 = vld [vmem:[%s8267_s14 + $0x70] sm:$0xff] }
 0xb5b   :  { %v2704_v5 = vrot.slane %v2703_v55, 4 }
 0xb5d   :  { %v2705_v11 = vadd.f32 %v2704_v5, %v2703_v55  ;;  %v4871_v55 = vld [vmem:[%s8267_s14 + $0x78] sm:$0xff] }
 0xb5f   :  { %v2706_v14 = vrot.slane %v2705_v11, 2 }
 0xb61   :  { %v2707_v50 = vadd.f32 %v2706_v14, %v2705_v11 }
 0xb63   :  { %v2708_v42 = vrot.slane %v2707_v50, 1 }
 0xb65   :  { %v2709_v62 = vadd.f32 %v2708_v42, %v2707_v50 }
 0xb67   :  { %v2710_v18 = vmul.f32 0.0078125, %v2709_v62 }
 0xb69   :  { %v2712_v2 = vadd.f32 1e-05, %v2710_v18 }
 0xb6b   :  { %6604 = vrsqrt.f32 %v2712_v2 }
 0xb75   :  { %v6605_v58 = vpop.eup %6604 }
 0xb76   :  { %v2714_v44 = vmul.f32 %v6605_v58, %v2711_v8 }
 0xb78   :  { %v2716_v49 = vmul.f32 %v2714_v44, %v7688_v0  ;;  %v2722_v53 = vrot.slane %v2714_v44, %v7264_v23 }
 0xb7a   :  { %v2717_v54 = vsub.f32 %v2715_v48, %v2716_v49  ;;  %v2724_v56 = vmul.f32 %v2722_v53, %v7683_v47  ;;  %v2725_v59 = vmul.f32 %v7681_v60, %v2722_v53 }
 0xb7c   :  { %v2730_v6 = vrot.slane %v2717_v54, %v7264_v23 }
 0xb7e   :  { %v2732_v61 = vadd.f32 %v2730_v6, %v2724_v56  ;;  %v2733_v13 = vadd.f32 %v2730_v6, %v2725_v59  ;;  %v6554_v6 = vld [vmem:[%s8268_s17 + $0x4] ss:$16 sps:$4 sm:$0xff]  }
 0xb80   :  { %v2734_v19 = vadd.f32 %v2732_v61, %v2040_v28  ;;  %v2735_v9 = vadd.f32 %v2733_v13, %v2041_v29  ;;  %v6552_v61 = vld [vmem:[%s8268_s17] ss:$16 sps:$4 sm:$0xff]   ;;  %v6555_v13 = vld [vmem:[%s8268_s17 + $0x8] ss:$16 sps:$4 sm:$0xff]  }
 0xb82   :  { %v2736_v15 = vmax.f32 %v2734_v19, 0.0  ;;  %v2737_v16 = vmax.f32 %v2735_v9, 0.0  ;;  %v6557_v19 = vld [vmem:[%s8268_s17 + $0xc] ss:$16 sps:$4 sm:$0xff]   ;;  %v6560_v9 = vld [vmem:[%s8268_s17 + $0x24] ss:$16 sps:$4 sm:$0xff]  }
 0xb84   :  { %v2738_v0 = vpack.c.bf16 %v2737_v16, %v2736_v15  ;;  %v6563_v15 = vld [vmem:[%s8268_s17 + $0x2c] ss:$16 sps:$4 sm:$0xff]   ;;  %v6558_v16 = vld [vmem:[%s8268_s17 + $0x20] ss:$16 sps:$4 sm:$0xff]  }
 0xb86   :  { %2964 = vmatmul.mubr.bf16.vlgmr.msra.gmra.mrb[40].mxu0 %v2738_v0  ;;  %3007 = vmatmul.mubr.bf16.vlgmr.msra.gmra.mrb[44].mxu1 %v2738_v0  ;;  %v6561_v0 = vld [vmem:[%s8268_s17 + $0x28] ss:$16 sps:$4 sm:$0xff]  }
 0xb87   :  { %6217 = vmatpush3.bf16.msk.msra.mxu1 %vm6897_vm4, %v6625_v3  ;;  %5706 = vmatprep.mubr.msk.f32.mxu0 %vm2292_vm0, %v4848_v24  ;;  %v6566_v24 = vld [vmem:[%s8268_s17 + $0x44] ss:$16 sps:$4 sm:$0xff]  }
 0xb88   :  { %6219 = vmatprep.subr.msk.bf16.mxu1 %vm6907_vm6, %v6625_v3 }
 0xb8b   :  { %6221 = vmatpush3.bf16.msk.msra.mxu1 %vm6907_vm6, %v6625_v3 }
 0xb8c   :  { %6223 = vmatprep.subr.msk.bf16.mxu1 %vm6925_vm9, %v6625_v3 }
 0xb8f   :  { %6225 = vmatpush3.bf16.msk.msra.mxu1 %vm6925_vm9, %v6625_v3 }
 0xb90   :  { %6227 = vmatprep.subr.msk.bf16.mxu1 %vm6945_vm12, %v6625_v3 }
 0xb93   :  { %6229 = vmatpush3.bf16.msk.msra.mxu1 %vm6945_vm12, %v6625_v3 }
 0xb94   :  { %6231 = vmatprep.subr.msk.bf16.mxu1 %vm8332_vm15, %v6625_v3 }
 0xb97   :  { %6233 = vmatpush3.bf16.msk.msra.mxu1 %vm8332_vm15, %v6625_v3 }
 0xb98   :  { %6235 = vmatprep.subr.msk.bf16.mxu1 %vm8333_vm3, %v6625_v3 }
 0xb9b   :  { %6237 = vmatpush3.bf16.msk.msra.mxu1 %vm8333_vm3, %v6625_v3 }
 0xb9c   :  { %6239 = vmatprep.subr.msk.bf16.mxu1 %vm8334_vm8, %v6625_v3 }
 0xb9f   :  { %6241 = vmatpush3.bf16.msk.msra.mxu1 %vm8334_vm8, %v6625_v3 }
 0xba0   :  { %6243 = vmatprep.subr.msk.bf16.mxu1 %vm8335_vm13, %v6625_v3 }
 0xba3   :  { %6245 = vmatpush3.bf16.msk.msra.mxu1 %vm8335_vm13, %v6625_v3 }
 0xba4   :  { %3855 = vmatprep.subr.bf16.mxu1 %v6554_v6 }
 0xc59   :  { %v2965_v27 = vpop.f32.mrb[40].mxu0  ;;  %v3008_v28 = vpop.f32.mrb[44].mxu1 }
 0xc5a   :  { %v2967_v29 = vpop.f32.mrb[41].mxu0  ;;  %v3010_v60 = vpop.f32.mrb[45].mxu1 }
 0xc5b   :  { %v2969_v47 = vpop.f32.mrb[42].mxu0  ;;  %v3012_v20 = vpop.f32.mrb[46].mxu1 }
 0xc5c   :  { %v6202_v21 = vpack.c.bf16 %v2969_v47, %v2965_v27  ;;  %v6206_v10 = vpack.c.bf16 %v3012_v20, %v3008_v28  ;;  %v2971_v51 = vpop.f32.mrb[43].mxu0  ;;  %v3014_v57 = vpop.f32.mrb[47].mxu1  ;;  %v6569_v27 = vld [vmem:[%s8268_s17 + $0x4c] ss:$16 sps:$4 sm:$0xff]   ;;  %v6564_v28 = vld [vmem:[%s8268_s17 + $0x40] ss:$16 sps:$4 sm:$0xff]  }
 0xc5d   :  { %v6198_v31 = vpack.c.bf16 %v2971_v51, %v2967_v29  ;;  %v6210_v32 = vpack.c.bf16 %v3014_v57, %v3010_v60  ;;  %v6567_v29 = vld [vmem:[%s8268_s17 + $0x48] ss:$16 sps:$4 sm:$0xff]   ;;  %v6572_v60 = vld [vmem:[%s8268_s17 + $0x64] ss:$16 sps:$4 sm:$0xff]   ;;  %v6575_v47 = vld [vmem:[%s8268_s17 + $0x6c] ss:$16 sps:$4 sm:$0xff]  }
 0xc5e   :  { %v6570_v20 = vld [vmem:[%s8268_s17 + $0x60] ss:$16 sps:$4 sm:$0xff]   ;;  %v6581_v51 = vld [vmem:[%s8268_s17 + $0x8c] ss:$16 sps:$4 sm:$0xff]  }
 0xc5f   :  { %6199 = vmatprep.subr.bf16.mxu0 %v6198_v31  ;;  %v6576_v57 = vld [vmem:[%s8268_s17 + $0x80] ss:$16 sps:$4 sm:$0xff]  }
 0xc60   :  { %6201 = vmatpush3.bf16.msra.mxu0 %v6198_v31  ;;  %v6579_v31 = vld [vmem:[%s8268_s17 + $0x88] ss:$16 sps:$4 sm:$0xff]  }
 0xc61   :  { %6203 = vmatprep.subr.bf16.mxu0 %v6202_v21 }
 0xc63   :  { %5707 = vmatmul.mubr.msk.f32.vlgmr.msra.gmra.mrb[38].mxu0 %vm2292_vm0, %v4849_v33  ;;  %v6587_v33 = vld [vmem:[%s8268_s17 + $0xac] ss:$16 sps:$4 sm:$0xff]  }
 0xc64   :  { %6205 = vmatpush3.bf16.msra.mxu0 %v6202_v21  ;;  %5709 = vmatprep.mubr.msk.f32.mxu0 %vm2292_vm0, %v4850_v35  ;;  %v6573_v21 = vld [vmem:[%s8268_s17 + $0x68] ss:$16 sps:$4 sm:$0xff]   ;;  %v6582_v35 = vld [vmem:[%s8268_s17 + $0xa0] ss:$16 sps:$4 sm:$0xff]  }
 0xc65   :  { %6207 = vmatprep.subr.bf16.mxu0 %v6206_v10 }
 0xc67   :  { %5710 = vmatmul.mubr.msk.f32.gmra.mrb[44].mxu0 %vm2292_vm0, %v4851_v37  ;;  %v6585_v37 = vld [vmem:[%s8268_s17 + $0xa8] ss:$16 sps:$4 sm:$0xff]  }
 0xc68   :  { %5716 = vmatprep.mubr.msk.f32.mxu0 %vm2292_vm0, %v3017_v38  ;;  %v6590_v38 = vld [vmem:[%s8268_s17 + $0xc4] ss:$16 sps:$4 sm:$0xff]  }
 0xc6b   :  { %5717 = vmatmul.mubr.msk.f32.vlgmr.msra.gmra.mrb[38].mxu0 %vm2292_vm0, %v3018_v39  ;;  %v6593_v39 = vld [vmem:[%s8268_s17 + $0xcc] ss:$16 sps:$4 sm:$0xff]  }
 0xc6c   :  { %6209 = vmatpush3.bf16.msra.mxu0 %v6206_v10  ;;  %5719 = vmatprep.mubr.msk.f32.mxu0 %vm2292_vm0, %v3019_v40  ;;  %v6578_v10 = vld [vmem:[%s8268_s17 + $0x84] ss:$16 sps:$4 sm:$0xff]   ;;  %v6588_v40 = vld [vmem:[%s8268_s17 + $0xc0] ss:$16 sps:$4 sm:$0xff]  }
 0xc6d   :  { %6211 = vmatprep.subr.bf16.mxu0 %v6210_v32 }
 0xc6f   :  { %5720 = vmatmul.mubr.msk.f32.gmra.mrb[44].mxu0 %vm2292_vm0, %v3020_v41  ;;  %v6596_v41 = vld [vmem:[%s8268_s17 + $0xe4] ss:$16 sps:$4 sm:$0xff]  }
 0xc70   :  { %5726 = vmatprep.mubr.msk.f32.mxu0 %vm2292_vm0, %v4860_v43  ;;  %v6591_v43 = vld [vmem:[%s8268_s17 + $0xc8] ss:$16 sps:$4 sm:$0xff]  }
 0xc73   :  { %5727 = vmatmul.mubr.msk.f32.vlgmr.msra.gmra.mrb[38].mxu0 %vm2292_vm0, %v4861_v30  ;;  %v6599_v30 = vld [vmem:[%s8268_s17 + $0xec] ss:$16 sps:$4 sm:$0xff]  }
 0xc74   :  { %6213 = vmatpush3.bf16.msra.mxu0 %v6210_v32  ;;  %5729 = vmatprep.mubr.msk.f32.mxu0 %vm2292_vm0, %v4862_v45  ;;  %v6584_v32 = vld [vmem:[%s8268_s17 + $0xa4] ss:$16 sps:$4 sm:$0xff]   ;;  %v6594_v45 = vld [vmem:[%s8268_s17 + $0xe0] ss:$16 sps:$4 sm:$0xff]  }
 0xc75   :  { %6247 = vmatprep.subr.msk.bf16.mxu0 %vm6897_vm4, %v6625_v3 }
 0xc77   :  { %5730 = vmatmul.mubr.msk.f32.gmra.mrb[44].mxu0 %vm2292_vm0, %v4863_v46  ;;  %v6597_v46 = vld [vmem:[%s8268_s17 + $0xe8] ss:$16 sps:$4 sm:$0xff]  }
 0xc78   :  { %5736 = vmatprep.mubr.msk.f32.mxu0 %vm2292_vm0, %v4868_v34 }
 0xc7b   :  { %5737 = vmatmul.mubr.msk.f32.vlgmr.msra.gmra.mrb[38].mxu0 %vm2292_vm0, %v4869_v36 }
 0xc7c   :  { %5739 = vmatprep.mubr.msk.f32.mxu0 %vm2292_vm0, %v4870_v52  ;;  %6249 = vmatpush3.bf16.msk.msra.mxu0 %vm6897_vm4, %v6625_v3  ;;  %vm8336_vm4 = vmmov %vm8331_vm1 }
 0xc7d   :  { %6251 = vmatprep.subr.msk.bf16.mxu0 %vm6907_vm6, %v6625_v3 }
 0xc7f   :  { %5740 = vmatmul.mubr.msk.f32.gmra.mrb[44].mxu0 %vm2292_vm0, %v4871_v55  ;;  %vm8346_vm0 = vmmov %vm8331_vm1 }
 0xc80   :  { %6253 = vmatpush3.bf16.msk.msra.mxu0 %vm6907_vm6, %v6625_v3  ;;  %vm8337_vm6 = vmmov %vm8331_vm1 }
 0xc81   :  { %6255 = vmatprep.subr.msk.bf16.mxu0 %vm6925_vm9, %v6625_v3 }
 0xc84   :  { %6257 = vmatpush3.bf16.msk.msra.mxu0 %vm6925_vm9, %v6625_v3  ;;  %vm8338_vm9 = vmmov %vm8331_vm1 }
 0xc85   :  { %6259 = vmatprep.subr.msk.bf16.mxu0 %vm6945_vm12, %v6625_v3 }
 0xc88   :  { %6261 = vmatpush3.bf16.msk.msra.mxu0 %vm6945_vm12, %v6625_v3  ;;  %vm8339_vm12 = vmmov %vm8331_vm1 }
 0xc89   :  { %6263 = vmatprep.subr.msk.bf16.mxu0 %vm8332_vm15, %v6625_v3 }
 0xc8c   :  { %6265 = vmatpush3.bf16.msk.msra.mxu0 %vm8332_vm15, %v6625_v3  ;;  %vm8347_vm15 = vmmov %vm8346_vm0 }
 0xc8d   :  { %6267 = vmatprep.subr.msk.bf16.mxu0 %vm8333_vm3, %v6625_v3 }
 0xc90   :  { %6269 = vmatpush3.bf16.msk.msra.mxu0 %vm8333_vm3, %v6625_v3  ;;  %vm8348_vm3 = vmmov %vm8346_vm0 }
 0xc91   :  { %6271 = vmatprep.subr.msk.bf16.mxu0 %vm8334_vm8, %v6625_v3 }
 0xc94   :  { %6273 = vmatpush3.bf16.msk.msra.mxu0 %vm8334_vm8, %v6625_v3  ;;  %vm8349_vm8 = vmmov %vm8346_vm0 }
 0xc95   :  { %6275 = vmatprep.subr.msk.bf16.mxu0 %vm8335_vm13, %v6625_v3 }
 0xc98   :  { %6277 = vmatpush3.bf16.msk.msra.mxu0 %vm8335_vm13, %v6625_v3  ;;  %vm8350_vm13 = vmmov %vm8346_vm0 }
 0xc99   :  { %3908 = vmatprep.subr.bf16.mxu0 %v6557_v19 }
 0xd4e   :  { %v7966_v63 = vpop.f32.mrb[38].mxu0 }
 0xd4f   :  { %v7968_v4 = vpop.f32.mrb[39].mxu0 }
 0xd50   :  { %5774 = vmatprep.mubr.f32.mxu1 %v7968_v4 }
 0xd51   :  { %5775 = vmatmul.mubr.f32.vlgmr.msra.gmra.mrb[42].mxu1 %v7966_v63 }
 0xd52   :  { %v7972_v7 = vpop.f32.mrb[44].mxu0  ;;  %3856 = vmatpush1.bf16.msra.mxu1 %v6552_v61 }
 0xd53   :  { %v7974_v12 = vpop.f32.mrb[45].mxu0  ;;  %3857 = vmatprep.subr.bf16.mxu1 %v6560_v9 }
 0xd54   :  { %5777 = vmatprep.mubr.f32.mxu1 %v7974_v12 }
 0xd55   :  { %5778 = vmatmul.mubr.f32.gmra.mrb[48].mxu1 %v7972_v7 }
 0xd56   :  { %3887 = vmatprep.mubr.bf16.mxu1 %v6624_v1  ;;  %3858 = vmatpush1.bf16.msra.mxu1 %v6558_v16 }
 0xd57   :  { %3859 = vmatprep.subr.bf16.mxu1 %v6566_v24 }
 0xd5a   :  { %3860 = vmatpush1.bf16.msra.mxu1 %v6564_v28 }
 0xd5b   :  { %3861 = vmatprep.subr.bf16.mxu1 %v6572_v60 }
 0xd5e   :  { %3862 = vmatpush1.bf16.msra.mxu1 %v6570_v20 }
 0xd5f   :  { %3863 = vmatprep.subr.bf16.mxu1 %v6578_v10 }
 0xd62   :  { %3864 = vmatpush1.bf16.msra.mxu1 %v6576_v57 }
 0xd63   :  { %3865 = vmatprep.subr.bf16.mxu1 %v6584_v32 }
 0xd66   :  { %3866 = vmatpush1.bf16.msra.mxu1 %v6582_v35 }
 0xd67   :  { %3867 = vmatprep.subr.bf16.mxu1 %v6590_v38 }
 0xd6a   :  { %3868 = vmatpush1.bf16.msra.mxu1 %v6588_v40 }
 0xd6b   :  { %3869 = vmatprep.subr.bf16.mxu1 %v6596_v41 }
 0xd6e   :  { %3870 = vmatpush1.bf16.msra.mxu1 %v6594_v45 }
 0xe24   :  { %v5776_v17 = vpop.f32.mrb[42].mxu1 }
 0xe25   :  { %v3498_v3 = vpop.f32.mrb[43].mxu1 }
 0xe26   :  { %v3517_v22 = vadd.f32 %v5776_v17, %v3498_v3 }
 0xe28   :  { %v5779_v25 = vpop.f32.mrb[48].mxu1 }
 0xe29   :  { %v3508_v26 = vpop.f32.mrb[49].mxu1 }
 0xe2a   :  { %v3518_v5 = vadd.f32 %v3517_v22, %v3508_v26 }
 0xe2c   :  { %v3519_v11 = vadd.f32 %v5779_v25, %v3518_v5 }
 0xe2e   :  { %v3520_v14 = vrot.slane %v3519_v11, 4 }
 0xe30   :  { %v3521_v50 = vadd.f32 %v3520_v14, %v3519_v11 }
 0xe32   :  { %v3522_v42 = vrot.slane %v3521_v50, 2 }
 0xe34   :  { %v3523_v62 = vadd.f32 %v3522_v42, %v3521_v50 }
 0xe36   :  { %v3524_v18 = vrot.slane %v3523_v62, 1 }
 0xe38   :  { %v3525_v2 = vadd.f32 %v3524_v18, %v3523_v62  ;;  %v3630_v18 = vld [vmem:[%s8269_s15] sm:$0x1] }
 0xe3a   :  { %v7979_v8 = vmul.f32 0.001953125, %v3525_v2 }
 0xe3c   :  { %v3527_v58 = vsub.f32 %v7968_v4, %v7979_v8  ;;  %v3528_v44 = vsub.f32 %v7966_v63, %v7979_v8  ;;  %v3529_v48 = vsub.f32 %v7974_v12, %v7979_v8  ;;  %v3530_v54 = vsub.f32 %v7972_v7, %v7979_v8 }
 0xe3e   :  { %v3531_v49 = vmul.f32 %v3527_v58, %v3527_v58  ;;  %v3532_v53 = vmul.f32 %v3528_v44, %v3528_v44  ;;  %v3533_v56 = vmul.f32 %v3529_v48, %v3529_v48  ;;  %v3534_v59 = vmul.f32 %v3530_v54, %v3530_v54  ;;  %v3634_v44 = vld [vmem:[%s8270_s16] sm:$0x1] }
 0xe40   :  { %5812 = vmatprep.mubr.f32.mxu0 %v3531_v49 }
 0xe41   :  { %5813 = vmatmul.mubr.f32.vlgmr.msra.gmra.mrb[46].mxu0 %v3532_v53 }
 0xe42   :  { %5815 = vmatprep.mubr.f32.mxu0 %v3533_v56  ;;  %3909 = vmatpush1.bf16.msra.mxu0 %v6555_v13 }
 0xe43   :  { %3910 = vmatprep.subr.bf16.mxu0 %v6563_v15 }
 0xe45   :  { %5816 = vmatmul.mubr.f32.gmra.mrb[48].mxu0 %v3534_v59 }
 0xe46   :  { %3940 = vmatprep.mubr.bf16.mxu0 %v6624_v1  ;;  %3911 = vmatpush1.bf16.msra.mxu0 %v6561_v0 }
 0xe47   :  { %3912 = vmatprep.subr.bf16.mxu0 %v6569_v27 }
 0xe4a   :  { %3913 = vmatpush1.bf16.msra.mxu0 %v6567_v29 }
 0xe4b   :  { %3914 = vmatprep.subr.bf16.mxu0 %v6575_v47 }
 0xe4e   :  { %3915 = vmatpush1.bf16.msra.mxu0 %v6573_v21 }
 0xe4f   :  { %3916 = vmatprep.subr.bf16.mxu0 %v6581_v51 }
 0xe52   :  { %3917 = vmatpush1.bf16.msra.mxu0 %v6579_v31 }
 0xe53   :  { %3918 = vmatprep.subr.bf16.mxu0 %v6587_v33 }
 0xe56   :  { %3919 = vmatpush1.bf16.msra.mxu0 %v6585_v37 }
 0xe57   :  { %3920 = vmatprep.subr.bf16.mxu0 %v6593_v39 }
 0xe5a   :  { %3921 = vmatpush1.bf16.msra.mxu0 %v6591_v43 }
 0xe5b   :  { %3922 = vmatprep.subr.bf16.mxu0 %v6599_v30 }
 0xe5e   :  { %3923 = vmatpush1.bf16.msra.mxu0 %v6597_v46  ;;  %v3964_v46 = vld [vmem:[%s8271_s18 + $0x18] sm:$0xff] }
 0xf14   :  { %v5814_v34 = vpop.f32.mrb[46].mxu0 }
 0xf15   :  { %v3601_v36 = vpop.f32.mrb[47].mxu0 }
 0xf16   :  { %v3620_v52 = vadd.f32 %v5814_v34, %v3601_v36  ;;  %v4941_v34 = vld [vmem:[%s8271_s18 + $0x48] sm:$0xff]  ;;  %v3965_v36 = vld [vmem:[%s8271_s18 + $0x20] sm:$0xff] }
 0xf18   :  { %v5817_v55 = vpop.f32.mrb[48].mxu0 }
 0xf19   :  { %v3611_v17 = vpop.f32.mrb[49].mxu0 }
 0xf1a   :  { %v3621_v3 = vadd.f32 %v3620_v52, %v3611_v17  ;;  %v3966_v52 = vld [vmem:[%s8271_s18 + $0x28] sm:$0xff]  ;;  %v3967_v17 = vld [vmem:[%s8271_s18 + $0x30] sm:$0xff] }
 0xf1c   :  { %v3622_v22 = vadd.f32 %v5817_v55, %v3621_v3  ;;  %v4942_v55 = vld [vmem:[%s8271_s18 + $0x50] sm:$0xff]  ;;  %v4943_v3 = vld [vmem:[%s8271_s18 + $0x58] sm:$0xff] }
 0xf1e   :  { %v3623_v25 = vrot.slane %v3622_v22, 4 }
 0xf20   :  { %v3624_v26 = vadd.f32 %v3623_v25, %v3622_v22  ;;  %v3968_v22 = vld [vmem:[%s8271_s18 + $0x38] sm:$0xff]  ;;  %v4944_v25 = vld [vmem:[%s8271_s18 + $0x60] sm:$0xff] }
 0xf22   :  { %v3625_v5 = vrot.slane %v3624_v26, 2 }
 0xf24   :  { %v3626_v11 = vadd.f32 %v3625_v5, %v3624_v26  ;;  %v4964_v26 = vld [vmem:[%s8271_s18 + $0x80] sm:$0xff]  ;;  %v4945_v5 = vld [vmem:[%s8271_s18 + $0x68] sm:$0xff] }
 0xf26   :  { %v3627_v14 = vrot.slane %v3626_v11, 1 }
 0xf28   :  { %v3628_v50 = vadd.f32 %v3627_v14, %v3626_v11  ;;  %v4965_v11 = vld [vmem:[%s8271_s18 + $0x88] sm:$0xff]  ;;  %v4946_v14 = vld [vmem:[%s8271_s18 + $0x70] sm:$0xff] }
 0xf2a   :  { %v3629_v42 = vmul.f32 0.001953125, %v3628_v50  ;;  %v4966_v50 = vld [vmem:[%s8271_s18 + $0x90] sm:$0xff] }
 0xf2c   :  { %v3631_v62 = vadd.f32 1e-05, %v3629_v42  ;;  %v4947_v42 = vld [vmem:[%s8271_s18 + $0x78] sm:$0xff] }
 0xf2e   :  { %6606 = vrsqrt.f32 %v3631_v62  ;;  %v4967_v62 = vld [vmem:[%s8271_s18 + $0x98] sm:$0xff] }
 0xf38   :  { %v6607_v2 = vpop.eup %6606 }
 0xf39   :  { %v3633_v58 = vmul.f32 %v6607_v2, %v3630_v18  ;;  %v3961_v18 = vld [vmem:[%s8271_s18] sm:$0xff] }
 0xf3a   :  { %v4968_v2 = vld [vmem:[%s8271_s18 + $0xa0] sm:$0xff] }
 0xf3b   :  { %v3635_v48 = vmul.f32 %v3633_v58, %v7979_v8  ;;  %v3641_v49 = vrot.slane %v3633_v58, %v7264_v23  ;;  %v3962_v58 = vld [vmem:[%s8271_s18 + $0x8] sm:$0xff] }
 0xf3d   :  { %v3636_v53 = vsub.f32 %v3634_v44, %v3635_v48  ;;  %v3643_v54 = vmul.f32 %v3641_v49, %v7968_v4  ;;  %v3644_v56 = vmul.f32 %v7966_v63, %v3641_v49  ;;  %v3645_v59 = vmul.f32 %v3641_v49, %v7974_v12  ;;  %v4940_v63 = vld [vmem:[%s8271_s18 + $0x40] sm:$0xff]  ;;  %v4969_v44 = vld [vmem:[%s8271_s18 + $0xa8] sm:$0xff]  ;;  %v4970_v48 = vld [vmem:[%s8271_s18 + $0xb0] sm:$0xff] }
 0xf3e   :  { %v3646_v6 = vmul.f32 %v7972_v7, %v3641_v49  ;;  %v4971_v49 = vld [vmem:[%s8271_s18 + $0xb8] sm:$0xff] }
 0xf3f   :  { %v3651_v61 = vrot.slane %v3636_v53, %v7264_v23  ;;  %v3963_v23 = vld [vmem:[%s8271_s18 + $0x10] sm:$0xff]  ;;  %v4980_v53 = vld [vmem:[%s8271_s18 + $0xc0] sm:$0xff] }
 0xf41   :  { %v3653_v13 = vadd.f32 %v3651_v61, %v3643_v54  ;;  %v3654_v19 = vadd.f32 %v3651_v61, %v3644_v56  ;;  %v3655_v9 = vadd.f32 %v3651_v61, %v3645_v59  ;;  %v3656_v15 = vadd.f32 %v3651_v61, %v3646_v6  ;;  %v4981_v54 = vld [vmem:[%s8271_s18 + $0xc8] sm:$0xff]  ;;  %v4982_v56 = vld [vmem:[%s8271_s18 + $0xd0] sm:$0xff]  ;;  %v4983_v59 = vld [vmem:[%s8271_s18 + $0xd8] sm:$0xff] }
 0xf42   :  { %v4984_v6 = vld [vmem:[%s8271_s18 + $0xe0] sm:$0xff]  ;;  %v4985_v61 = vld [vmem:[%s8271_s18 + $0xe8] sm:$0xff] }
 0xf43   :  { %v3657_v16 = vmax.f32 %v3653_v13, 0.0  ;;  %v3658_v0 = vmax.f32 %v3654_v19, 0.0  ;;  %v3659_v8 = vmax.f32 %v3655_v9, 0.0  ;;  %v3660_v24 = vmax.f32 %v3656_v15, 0.0  ;;  %v4986_v13 = vld [vmem:[%s8271_s18 + $0xf0] sm:$0xff]  ;;  %v4987_v19 = vld [vmem:[%s8271_s18 + $0xf8] sm:$0xff] }
 0xf45   :  { %v3661_v27 = vpack.c.bf16 %v3658_v0, %v3657_v16  ;;  %v3662_v28 = vpack.c.bf16 %v3660_v24, %v3659_v8 }
 0xf47   :  { %3888 = vmatmul.mubr.bf16.vlgmr.msra.gmra.mrb[52].mxu1 %v3661_v27  ;;  %3941 = vmatmul.mubr.bf16.vlgmr.msra.gmra.mrb[52].mxu0 %v3661_v27 }
 0xf48   :  { %3897 = vmatprep.mubr.bf16.mxu1 %v6624_v1  ;;  %3950 = vmatprep.mubr.bf16.mxu0 %v6624_v1 }
 0xf4f   :  { %3898 = vmatmul.mubr.bf16.gmra.mrb[56].mxu1 %v3662_v28  ;;  %3951 = vmatmul.mubr.bf16.gmra.mrb[56].mxu0 %v3662_v28 }
 0xf50   :  { %5849 = vmatprep.mubr.msk.f32.mxu1 %vm8336_vm4, %v3963_v23  ;;  %5826 = vmatprep.mubr.msk.f32.mxu0 %vm8337_vm6, %v4940_v63  ;;  %vm8351_vm4 = vmmov %vm8346_vm0 }
 0xf51   :  { %vm8352_vm6 = vmmov %vm8346_vm0 }
0x101a   :  { %v3889_v4 = vpop.f32.mrb[52].mxu1  ;;  %v3942_v7 = vpop.f32.mrb[52].mxu0 }
0x101b   :  { %v3891_v12 = vpop.f32.mrb[53].mxu1  ;;  %v3944_v29 = vpop.f32.mrb[53].mxu0 }
0x101c   :  { %v3893_v60 = vpop.f32.mrb[54].mxu1  ;;  %v3946_v1 = vpop.f32.mrb[54].mxu0 }
0x101d   :  { %v6286_v47 = vpack.c.bf16 %v3893_v60, %v3889_v4  ;;  %v6294_v20 = vpack.c.bf16 %v3946_v1, %v3942_v7  ;;  %v3895_v21 = vpop.f32.mrb[55].mxu1  ;;  %v3948_v10 = vpop.f32.mrb[55].mxu0 }
0x101e   :  { %v6278_v51 = vpack.c.bf16 %v3895_v21, %v3891_v12  ;;  %v6302_v57 = vpack.c.bf16 %v3948_v10, %v3944_v29 }
0x101f   :  { %6310 = vmatprep.subr.bf16.mxu1 %v6286_v47 }
0x1020   :  { %6279 = vmatprep.subr.bf16.mxu0 %v6278_v51  ;;  %6312 = vmatpush3.bf16.msra.mxu1 %v6286_v47 }
0x1021   :  { %6281 = vmatpush3.bf16.msra.mxu0 %v6278_v51 }
0x1022   :  { %v3899_v31 = vpop.f32.mrb[56].mxu1  ;;  %v3952_v32 = vpop.f32.mrb[56].mxu0 }
0x1023   :  { %v3901_v33 = vpop.f32.mrb[57].mxu1  ;;  %v3954_v35 = vpop.f32.mrb[57].mxu0 }
0x1024   :  { %v3903_v37 = vpop.f32.mrb[58].mxu1  ;;  %v3956_v38 = vpop.f32.mrb[58].mxu0 }
0x1025   :  { %v6290_v39 = vpack.c.bf16 %v3903_v37, %v3899_v31  ;;  %v6298_v40 = vpack.c.bf16 %v3956_v38, %v3952_v32  ;;  %v3905_v41 = vpop.f32.mrb[59].mxu1  ;;  %v3958_v43 = vpop.f32.mrb[59].mxu0 }
0x1026   :  { %v6282_v30 = vpack.c.bf16 %v3905_v41, %v3901_v33  ;;  %v6306_v45 = vpack.c.bf16 %v3958_v43, %v3954_v35 }
0x1027   :  { %6311 = vmatprep.subr.bf16.mxu1 %v6290_v39 }
0x1028   :  { %6283 = vmatprep.subr.bf16.mxu0 %v6282_v30  ;;  %6313 = vmatpush3.bf16.msra.mxu1 %v6290_v39 }
0x1029   :  { %6285 = vmatpush3.bf16.msra.mxu0 %v6282_v30  ;;  %6295 = vmatprep.subr.bf16.mxu1 %v6294_v20 }
0x102a   :  { %6287 = vmatprep.subr.bf16.mxu0 %v6286_v47 }
0x102b   :  { %5850 = vmatmul.mubr.msk.f32.vlgmr.msra.gmra.mrb[50].mxu1 %vm8338_vm9, %v3964_v46  ;;  %vm8353_vm9 = vmmov %vm8346_vm0 }
0x102c   :  { %6297 = vmatpush3.bf16.msra.mxu1 %v6294_v20  ;;  %5827 = vmatmul.mubr.msk.f32.vlgmr.msra.gmra.mrb[50].mxu0 %vm8339_vm12, %v4941_v34  ;;  %vm8354_vm12 = vmmov %vm8346_vm0 }
0x102d   :  { %6289 = vmatpush3.bf16.msra.mxu0 %v6286_v47  ;;  %6299 = vmatprep.subr.bf16.mxu1 %v6298_v40 }
0x102e   :  { %6291 = vmatprep.subr.bf16.mxu0 %v6290_v39  ;;  %5852 = vmatprep.mubr.msk.f32.mxu1 %vm8340_vm5, %v3965_v36  ;;  %vm8355_vm5 = vmmov %vm8346_vm0 }
0x102f   :  { %5853 = vmatmul.mubr.msk.f32.gmra.mrb[60].mxu1 %vm8341_vm10, %v3966_v52  ;;  %5829 = vmatprep.mubr.msk.f32.mxu0 %vm8342_vm14, %v4942_v55  ;;  %vm8356_vm10 = vmmov %vm8346_vm0 }
0x1030   :  { %6301 = vmatpush3.bf16.msra.mxu1 %v6298_v40  ;;  %5855 = vmatprep.mubr.msk.f32.mxu1 %vm8343_vm7, %v3967_v17  ;;  %vm8357_vm14 = vmmov %vm8346_vm0 }
0x1031   :  { %6293 = vmatpush3.bf16.msra.mxu0 %v6290_v39  ;;  %6303 = vmatprep.subr.bf16.mxu1 %v6302_v57  ;;  %vm8358_vm7 = vmmov %vm8346_vm0 }
0x1032   :  { %5830 = vmatmul.mubr.msk.f32.gmra.mrb[60].mxu0 %vm8344_vm11, %v4943_v3  ;;  %vm8359_vm11 = vmmov %vm8346_vm0 }
0x1033   :  { %5856 = vmatmul.mubr.msk.f32.gmra.mrb[62].mxu1 %vm8331_vm1, %v3968_v22  ;;  %5832 = vmatprep.mubr.msk.f32.mxu0 %vm8345_vm2, %v4944_v25  ;;  %vm8360_vm1 = vmmov %vm8346_vm0 }
0x1034   :  { %5866 = vmatprep.mubr.msk.f32.mxu1 %vm8346_vm0, %v4964_v26  ;;  %vm8361_vm2 = vmmov %vm8346_vm0 }
0x1036   :  { %5833 = vmatmul.mubr.msk.f32.gmra.mrb[62].mxu0 %vm8347_vm15, %v4945_v5  ;;  %vm8362_vm15 = vmmov %vm8346_vm0 }
0x1037   :  { %5867 = vmatmul.mubr.msk.f32.vlgmr.msra.gmra.mrb[64].mxu1 %vm8348_vm3, %v4965_v11  ;;  %5835 = vmatprep.mubr.msk.f32.mxu0 %vm8349_vm8, %v4946_v14  ;;  %vm8363_vm3 = vmmov %vm8346_vm0 }
0x1038   :  { %6305 = vmatpush3.bf16.msra.mxu1 %v6302_v57  ;;  %5869 = vmatprep.mubr.msk.f32.mxu1 %vm8350_vm13, %v4966_v50  ;;  %vm8364_vm8 = vmmov %vm8346_vm0 }
0x1039   :  { %6307 = vmatprep.subr.bf16.mxu1 %v6306_v45  ;;  %vm8365_vm13 = vmmov %vm8346_vm0 }
0x103a   :  { %5836 = vmatmul.mubr.msk.f32.gmra.mrb[64].mxu0 %vm8351_vm4, %v4947_v42 }
0x103b   :  { %5870 = vmatmul.mubr.msk.f32.gmra.mrb[50].mxu1 %vm8352_vm6, %v4967_v62  ;;  %5846 = vmatprep.mubr.msk.f32.mxu0 %vm8353_vm9, %v3961_v18 }
0x103c   :  { %6309 = vmatpush3.bf16.msra.mxu1 %v6306_v45  ;;  %5872 = vmatprep.mubr.msk.f32.mxu1 %vm8354_vm12, %v4968_v2 }
0x103e   :  { %5847 = vmatmul.mubr.msk.f32.vlgmr.msra.gmra.mrb[50].mxu0 %vm8355_vm5, %v3962_v58 }
0x103f   :  { %5873 = vmatmul.mubr.msk.f32.gmra.mrb[60].mxu1 %vm8356_vm10, %v4969_v44 }
0x1040   :  { %5875 = vmatprep.mubr.msk.f32.mxu1 %vm8357_vm14, %v4970_v48 }
0x1043   :  { %5876 = vmatmul.mubr.msk.f32.gmra.mrb[62].mxu1 %vm8358_vm7, %v4971_v49 }
0x1044   :  { %5886 = vmatprep.mubr.msk.f32.mxu1 %vm8359_vm11, %v4980_v53 }
0x1047   :  { %5887 = vmatmul.mubr.msk.f32.vlgmr.msra.gmra.mrb[64].mxu1 %vm8360_vm1, %v4981_v54 }
0x1048   :  { %5889 = vmatprep.mubr.msk.f32.mxu1 %vm8361_vm2, %v4982_v56 }
0x104b   :  { %5890 = vmatmul.mubr.msk.f32.gmra.mrb[50].mxu1 %vm8346_vm0, %v4983_v59 }
0x104c   :  { %5892 = vmatprep.mubr.msk.f32.mxu1 %vm8362_vm15, %v4984_v6 }
0x104f   :  { %5893 = vmatmul.mubr.msk.f32.gmra.mrb[60].mxu1 %vm8363_vm3, %v4985_v61 }
0x1050   :  { %5895 = vmatprep.mubr.msk.f32.mxu1 %vm8364_vm8, %v4986_v13 }
0x1053   :  { %5896 = vmatmul.mubr.msk.f32.gmra.mrb[62].mxu1 %vm8365_vm13, %v4987_v19 }
0x1105   :  { %v5831_v9 = vpop.f32.mrb[60].mxu0 }
0x1106   :  { %v4078_v15 = vpop.f32.mrb[61].mxu0 }
0x1109   :  { %v5834_v16 = vpop.f32.mrb[62].mxu0 }
0x110a   :  { %v4088_v0 = vpop.f32.mrb[63].mxu0 }
0x110d   :  { %v5837_v8 = vpop.f32.mrb[64].mxu0 }
0x110e   :  { %v4098_v24 = vpop.f32.mrb[65].mxu0 }
0x1111   :  { %v5848_v27 = vpop.f32.mrb[50].mxu0 }
0x1112   :  { %v4197_v28 = vpop.f32.mrb[51].mxu0 }
0x111a   :  { %v5888_v23 = vpop.f32.mrb[64].mxu1 }
0x111b   :  { %v6314_v63 = vadd.f32 %v5888_v23, %v5848_v27  ;;  %v4481_v4 = vpop.f32.mrb[65].mxu1 }
0x111c   :  { %v6315_v7 = vadd.f32 %v4481_v4, %v4197_v28 }
0x111d   :  { %6608 = vtanh.f32 %v6314_v63 }
0x111e   :  { %6610 = vtanh.f32 %v6315_v7  ;;  %v5891_v12 = vpop.f32.mrb[50].mxu1 }
0x111f   :  { %v6316_v29 = vadd.f32 %v5891_v12, %v5831_v9  ;;  %v4491_v60 = vpop.f32.mrb[51].mxu1 }
0x1120   :  { %v6317_v1 = vadd.f32 %v4491_v60, %v4078_v15 }
0x1121   :  { %6612 = vtanh.f32 %v6316_v29 }
0x1122   :  { %6614 = vtanh.f32 %v6317_v1  ;;  %v5894_v47 = vpop.f32.mrb[60].mxu1 }
0x1123   :  { %v6318_v20 = vadd.f32 %v5894_v47, %v5834_v16  ;;  %v4501_v21 = vpop.f32.mrb[61].mxu1 }
0x1124   :  { %v6319_v10 = vadd.f32 %v4501_v21, %v4088_v0 }
0x1125   :  { %6616 = vtanh.f32 %v6318_v20 }
0x1126   :  { %6618 = vtanh.f32 %v6319_v10  ;;  %v5897_v51 = vpop.f32.mrb[62].mxu1 }
0x1127   :  { %v6609_v57 = vpop.eup %6608  ;;  %v6320_v31 = vadd.f32 %v5897_v51, %v5837_v8  ;;  %v4511_v32 = vpop.f32.mrb[63].mxu1 }
0x1128   :  { %v6611_v33 = vpop.eup %6610  ;;  %4537 = vst [vmem:[%s8272_s19 + $0x8] sm:$0xff] %v6609_v57  ;;  %v6321_v35 = vadd.f32 %v4511_v32, %v4098_v24 }
0x1129   :  { %4536 = vst [vmem:[%s8272_s19] sm:$0xff] %v6611_v33  ;;  %6620 = vtanh.f32 %v6320_v31 }
0x112a   :  { %6622 = vtanh.f32 %v6321_v35 }
0x112b   :  { %v6613_v37 = vpop.eup %6612 }
0x112c   :  { %v6615_v38 = vpop.eup %6614  ;;  %4539 = vst [vmem:[%s8272_s19 + $0x18] sm:$0xff] %v6613_v37 }
0x112d   :  { %4538 = vst [vmem:[%s8272_s19 + $0x10] sm:$0xff] %v6615_v38 }
0x112f   :  { %v6617_v39 = vpop.eup %6616 }
0x1130   :  { %v6619_v40 = vpop.eup %6618  ;;  %4541 = vst [vmem:[%s8272_s19 + $0x28] sm:$0xff] %v6617_v39 }
0x1131   :  { %4540 = vst [vmem:[%s8272_s19 + $0x20] sm:$0xff] %v6619_v40 }
0x1133   :  { %v6621_v41 = vpop.eup %6620 }
0x1134   :  { %v6623_v43 = vpop.eup %6622  ;;  %4543 = vst [vmem:[%s8272_s19 + $0x38] sm:$0xff] %v6621_v41 }
0x1135   :  { %4542 = vst [vmem:[%s8272_s19 + $0x30] sm:$0xff] %v6623_v43 }

</bundles_post_ra>
